<compile_context>
chip_gen: v7x
topology: tpu7x:2x2x1
jax: 0.10.0
libtpu: 0.0.40
codegen_flags: <defaults>
</compile_context>

<pallas_src>
import functools

import jax
import jax.numpy as jnp
from jax import lax
from jax.experimental import pallas as pl
from jax.experimental.pallas import tpu as pltpu

# sigmoid(1e9) == 1.0 exactly in f32, which makes the GRU cell an exact identity
# (h_new = n + 1*(h - n) = h; and exactly 0 when h == 0) on padded timesteps.
_GATE_SATURATE = 1e9


def _round_up(x, m):
    return (x + m - 1) // m * m


def _mask_gru_kernel(gxf_ref, gxb_ref, whh_hbm_ref, bhhn_hbm_ref,
                     of_ref, ob_ref,
                     whh_vmem, bhhn_vmem, hf_scratch, hb_scratch, copy_sem,
                     *, tt, hp, unroll):
    """One grid step = TT timesteps of both GRU directions.

    gx*_ref     : (TT, Bp, 3*Hp) precomputed input projections (+ folded biases),
                  storage dtype (bf16 or f32)
    whh_hbm_ref : (2, Hp, 3*Hp)  recurrent weights in HBM (fwd, bwd), storage dtype
    bhhn_hbm_ref: (2, Bp, Hp)    n-gate recurrent bias, pre-broadcast, f32
    o*_ref      : (TT, Bp, Hp)   per-timestep hidden states (lane-dense stores)
    whh_vmem    : (2, Hp, 3*Hp)  resident weight copy (filled once at grid step 0)
    bhhn_vmem   : (2, Bp, Hp)    resident bias copy
    h*_scratch  : (Bp, Hp)       carried hidden state (persists across grid steps)
    """
    i = pl.program_id(0)

    @pl.when(i == 0)
    def _init():
        hf_scratch[...] = jnp.zeros_like(hf_scratch)
        hb_scratch[...] = jnp.zeros_like(hb_scratch)
        # Weights DMA'd exactly once into resident VMEM scratch (no double-buffering,
        # no re-DMA on later grid steps).
        w_cp = pltpu.make_async_copy(whh_hbm_ref, whh_vmem, copy_sem.at[0])
        b_cp = pltpu.make_async_copy(bhhn_hbm_ref, bhhn_vmem, copy_sem.at[1])
        w_cp.start()
        b_cp.start()
        w_cp.wait()
        b_cp.wait()

    # Constant operands: loaded once per grid step, hoisted out of the time loop.
    whh_f = whh_vmem[0]
    whh_b = whh_vmem[1]
    bhhn_f = bhhn_vmem[0]          # already (Bp, Hp): no per-step broadcast_in_dim
    bhhn_b = bhhn_vmem[1]

    def cell(gx, h, whh, bhh_n):
        # gx already contains x@W_ih + b_ih (+ b_hh for the r,z gates).
        # Matmul in storage dtype (bf16 MXU-native on v6e/v7x), accumulate in f32.
        gh = jnp.dot(h.astype(whh.dtype), whh,
                     preferred_element_type=jnp.float32)        # (Bp, 3Hp)
        gx = gx.astype(jnp.float32)   # upcast right after load (v5e has no bf16 VPU/EUP)
        r = jax.nn.sigmoid(gx[:, :hp] + gh[:, :hp])
        z = jax.nn.sigmoid(gx[:, hp:2 * hp] + gh[:, hp:2 * hp])
        n = jnp.tanh(gx[:, 2 * hp:] + r * (gh[:, 2 * hp:] + bhh_n))
        return n + z * (h - n)        # == (1-z)*n + z*h, one VALU op shorter per step

    def step(j, carry):
        h_f, h_b = carry

        # ---- forward direction: local time j ----
        h_f = cell(gxf_ref[j], h_f, whh_f, bhhn_f)
        of_ref[j] = h_f.astype(of_ref.dtype)

        # ---- reverse direction: local time tt-1-j (block walked backwards) ----
        jr = tt - 1 - j
        h_b = cell(gxb_ref[jr], h_b, whh_b, bhhn_b)
        ob_ref[jr] = h_b.astype(ob_ref.dtype)
        return h_f, h_b

    h_f, h_b = lax.fori_loop(0, tt, step,
                             (hf_scratch[...], hb_scratch[...]),
                             unroll=unroll)
    hf_scratch[...] = h_f
    hb_scratch[...] = h_b


def mask_gru_forward(x_btd, seq_lens, params, *, tt=16, storage_dtype=jnp.bfloat16):
    """x_btd: (B, T, in_dim) float32, seq_lens: (B,) int32.  Returns (B, T, 2*H) f32."""
    B, T, Din = x_btd.shape
    (wih_f, whh_f, bih_f, bhh_f, wih_b, whh_b, bih_b, bhh_b) = params
    H = whh_f.shape[0]

    # Hardware-shaped padded sizes: lane tile 128, f32 sublane 8, time block TT.
    Hp = _round_up(H, 128)
    Bp = _round_up(B, 8)
    TT = max(1, min(tt, T))
    Tp = _round_up(T, TT)
    Tb = Tp // TT

    # Input mask from seq_lens; masked + time-major input in one fused XLA pass.
    mask_bt = (jnp.arange(T)[None, :] < seq_lens[:, None]).astype(x_btd.dtype)   # (B, T)
    xm_tbd = jnp.transpose(x_btd * mask_bt[:, :, None], (1, 0, 2))               # (T, B, Din)

    def make_gx(wih, bih, bhh):
        # Hoisted input projection for all timesteps (one big matmul), with b_ih
        # folded for all gates and b_hh folded for the r,z gates only.
        bias = bih[0] + jnp.concatenate(
            [bhh[0, :2 * H], jnp.zeros((H,), bhh.dtype)])
        gx = jnp.einsum('tbd,dg->tbg', xm_tbd, wih) + bias                       # (T, B, 3H)
        gx = gx.reshape(T, B, 3, H)
        if (Tp - T) or (Bp - B) or (Hp - H):
            gx = jnp.pad(gx, ((0, Tp - T), (0, Bp - B), (0, 0), (0, Hp - H)))
        if Tp > T:
            # Saturate the update gate (z) on padded timesteps: sigmoid(1e9)=1.0
            # exactly, so the GRU cell is an exact identity there and the reverse
            # carry stays exactly 0.  No per-timestep masking inside the kernel.
            gx = gx.at[T:, :, 1, :].set(_GATE_SATURATE)
        return gx.reshape(Tp, Bp, 3 * Hp).astype(storage_dtype)

    def pad_whh(whh):                       # (H, 3H) -> (Hp, 3Hp), gate-blocked
        w = whh.reshape(H, 3, H)
        if Hp - H:
            w = jnp.pad(w, ((0, Hp - H), (0, 0), (0, Hp - H)))
        return w.reshape(Hp, 3 * Hp)

    def pad_bhhn(bhh):                      # n-gate recurrent bias -> (Bp, Hp)
        b = bhh[:, 2 * H:]
        if Hp - H:
            b = jnp.pad(b, ((0, 0), (0, Hp - H)))
        return jnp.broadcast_to(b, (Bp, Hp))

    gx_f = make_gx(wih_f, bih_f, bhh_f)
    gx_b = make_gx(wih_b, bih_b, bhh_b)
    whh_p = jnp.stack([pad_whh(whh_f), pad_whh(whh_b)]).astype(storage_dtype)     # (2,Hp,3Hp)
    bhhn_p = jnp.stack([pad_bhhn(bhh_f), pad_bhhn(bhh_b)]).astype(jnp.float32)    # (2,Bp,Hp)

    # Explicit VMEM budget from the actual block footprint (+25% & 2 MiB headroom),
    # floored at 32 MiB, capped at 64 MiB (v7x physical ceiling).
    sd = jnp.dtype(storage_dtype).itemsize
    vmem_bytes = (
        2 * 2 * TT * Bp * 3 * Hp * sd      # gx fwd+bwd streams, double-buffered
        + 2 * 2 * TT * Bp * Hp * 4         # fwd+bwd output blocks, double-buffered
        + 2 * Hp * 3 * Hp * sd             # resident W_hh (both directions, 1 copy)
        + 2 * Bp * Hp * 4                  # resident b_hh_n (pre-broadcast)
        + 2 * Bp * Hp * 4                  # hidden-state carries
    )
    vmem_limit = int(min(max(vmem_bytes * 5 // 4 + (2 << 20), 32 << 20), 64 << 20))

    # Full unroll at small widths; partial unroll at production widths to bound
    # vreg live ranges (TT x 2 copies of (Bp,3Hp) gh intermediates otherwise).
    unroll = True if Hp < 512 else 4

    tmap = lambda i: (i, 0, 0)                 # forward: block i
    tmap_rev = lambda i: (Tb - 1 - i, 0, 0)    # reverse: blocks walked backwards

    kernel = functools.partial(_mask_gru_kernel, tt=TT, hp=Hp, unroll=unroll)

    out_f, out_b = pl.pallas_call(
        kernel,
        out_shape=(jax.ShapeDtypeStruct((Tp, Bp, Hp), jnp.float32),
                   jax.ShapeDtypeStruct((Tp, Bp, Hp), jnp.float32)),
        grid_spec=pltpu.PrefetchScalarGridSpec(
            num_scalar_prefetch=0,
            grid=(Tb,),
            in_specs=[
                pl.BlockSpec((TT, Bp, 3 * Hp), tmap),       # gx forward stream
                pl.BlockSpec((TT, Bp, 3 * Hp), tmap_rev),   # gx reverse stream
                pl.BlockSpec(memory_space=pl.ANY),          # W_hh (HBM, DMA'd once)
                pl.BlockSpec(memory_space=pl.ANY),          # b_hh_n (HBM, DMA'd once)
            ],
            out_specs=[
                pl.BlockSpec((TT, Bp, Hp), tmap),           # fwd outputs (lane-dense)
                pl.BlockSpec((TT, Bp, Hp), tmap_rev),       # bwd outputs (lane-dense)
            ],
            scratch_shapes=[
                pltpu.VMEM((2, Hp, 3 * Hp), storage_dtype),  # resident W_hh
                pltpu.VMEM((2, Bp, Hp), jnp.float32),        # resident b_hh_n
                pltpu.VMEM((Bp, Hp), jnp.float32),           # fwd hidden carry
                pltpu.VMEM((Bp, Hp), jnp.float32),           # bwd hidden carry
                pltpu.SemaphoreType.DMA((2,)),               # weight-copy semaphores
            ],
        ),
        compiler_params=pltpu.CompilerParams(
            dimension_semantics=("arbitrary",),              # recurrent axis
            vmem_limit_bytes=vmem_limit),
    )(gx_f, gx_b, whh_p, bhhn_p)

    # Un-pad, concat directions, back to batch-first, apply output mask.
    h_f = out_f[:T, :B, :H]
    h_b = out_b[:T, :B, :H]
    out = jnp.transpose(jnp.concatenate([h_f, h_b], axis=-1), (1, 0, 2))  # (B,T,2H)
    return out * mask_bt[:, :, None]


def _reference_forward(x_btd, seq_lens, params):
    """Pure-JAX reference matching PyTorch GRU (eval-mode dropout)."""
    B, T, Din = x_btd.shape
    (wih_f, whh_f, bih_f, bhh_f, wih_b, whh_b, bih_b, bhh_b) = params
    H = whh_f.shape[0]
    mask = (jnp.arange(T)[None, :] < seq_lens[:, None]).astype(jnp.float32)  # (B, T)
    xm = x_btd * mask[:, :, None]
    xm_t = jnp.transpose(xm, (1, 0, 2))  # (T, B, Din)

    def cell(h, xt, wih, whh, bih, bhh):
        gx = xt @ wih + bih
        gh = h @ whh + bhh
        r = jax.nn.sigmoid(gx[:, :H] + gh[:, :H])
        z = jax.nn.sigmoid(gx[:, H:2 * H] + gh[:, H:2 * H])
        n = jnp.tanh(gx[:, 2 * H:] + r * gh[:, 2 * H:])
        return (1.0 - z) * n + z * h

    h0 = jnp.zeros((B, H), jnp.float32)
    _, hs_f = lax.scan(lambda h, xt: (lambda hn: (hn, hn))(
        cell(h, xt, wih_f, whh_f, bih_f, bhh_f)), h0, xm_t)
    _, hs_b_rev = lax.scan(lambda h, xt: (lambda hn: (hn, hn))(
        cell(h, xt, wih_b, whh_b, bih_b, bhh_b)), h0, xm_t[::-1])
    hs_b = hs_b_rev[::-1]
    H_out = jnp.concatenate([hs_f, hs_b], axis=-1)           # (T, B, 2H)
    H_out = jnp.transpose(H_out, (1, 0, 2))                  # (B, T, 2H)
    return H_out * mask[:, :, None]


def init_params(key, in_dim, hidden):
    """PyTorch-style uniform(-1/sqrt(H), 1/sqrt(H)) init; weights stored transposed."""
    bound = 1.0 / jnp.sqrt(hidden)
    keys = jax.random.split(key, 8)
    u = lambda k, shape: jax.random.uniform(k, shape, jnp.float32, -bound, bound)
    wih_f = u(keys[0], (in_dim, 3 * hidden))
    whh_f = u(keys[1], (hidden, 3 * hidden))
    bih_f = u(keys[2], (1, 3 * hidden))
    bhh_f = u(keys[3], (1, 3 * hidden))
    wih_b = u(keys[4], (in_dim, 3 * hidden))
    whh_b = u(keys[5], (hidden, 3 * hidden))
    bih_b = u(keys[6], (1, 3 * hidden))
    bhh_b = u(keys[7], (1, 3 * hidden))
    return (wih_f, whh_f, bih_f, bhh_f, wih_b, whh_b, bih_b, bhh_b)


if __name__ == "__main__":
    B, T, IN_DIM, HIDDEN = 2, 8, 16, 32

    key = jax.random.PRNGKey(0)
    k_x, k_p = jax.random.split(key)
    x = jax.random.normal(k_x, (B, T, IN_DIM), dtype=jnp.float32)
    seq_lens = jnp.array([8, 5], dtype=jnp.int32)
    params = init_params(k_p, IN_DIM, HIDDEN)

    ref = _reference_forward(x, seq_lens, params)

    # (1) f32 streaming, tt=4 -> 2 time blocks: exercises the cross-block hidden
    #     carry, the reversed block index_map and the resident-weight DMA path.
    fwd_f32 = jax.jit(functools.partial(mask_gru_forward, tt=4,
                                        storage_dtype=jnp.float32))
    out_f32 = jax.block_until_ready(fwd_f32(x, seq_lens, params))
    assert out_f32.shape == (B, T, 2 * HIDDEN)
    err32 = float(jnp.max(jnp.abs(out_f32 - ref)))
    assert jnp.allclose(out_f32, ref, atol=1e-3, rtol=1e-3), \
        f"f32 mismatch vs reference (max abs err {err32})"

    # (2) bf16 streaming (production default), tt=5 -> Tp=10 with a padded tail:
    #     exercises the saturated-z identity steps and bf16 storage / f32 gate math.
    fwd_bf16 = jax.jit(functools.partial(mask_gru_forward, tt=5,
                                         storage_dtype=jnp.bfloat16))
    out_bf16 = jax.block_until_ready(fwd_bf16(x, seq_lens, params))
    assert out_bf16.shape == (B, T, 2 * HIDDEN)
    err16 = float(jnp.max(jnp.abs(out_bf16 - ref)))
    assert jnp.allclose(out_bf16, ref, atol=3e-2, rtol=3e-2), \
        f"bf16 mismatch vs reference (max abs err {err16})"

    print("KERNEL_OK")
</pallas_src>

<mosaic_0001>
module attributes {stable_mosaic.version = 11 : i64} {
  func.func @_mask_gru_kernel(%arg0: i32, %arg1: memref<4x8x384xf32, #tpu.memory_space<vmem>>, %arg2: memref<4x8x384xf32, #tpu.memory_space<vmem>>, %arg3: memref<2x128x384xf32, #tpu.memory_space<any>>, %arg4: memref<2x8x128xf32, #tpu.memory_space<any>>, %arg5: memref<4x8x128xf32, #tpu.memory_space<vmem>>, %arg6: memref<4x8x128xf32, #tpu.memory_space<vmem>>, %arg7: memref<2x128x384xf32, #tpu.memory_space<vmem>>, %arg8: memref<2x8x128xf32, #tpu.memory_space<vmem>>, %arg9: memref<8x128xf32, #tpu.memory_space<vmem>>, %arg10: memref<8x128xf32, #tpu.memory_space<vmem>>, %arg11: memref<2x!tpu.dma_semaphore, #tpu.memory_space<semaphore_mem>>) attributes {dimension_semantics = [#tpu.dimension_semantics<arbitrary>], iteration_bounds = array<i64: 2>, scalar_prefetch = 0 : i64, scratch_operands = 5 : i64, tpu.core_type = #tpu.core_type<tc>, window_params = [{transform_indices = @transform_0, window_bounds = array<i64: 4, 8, 384>}, {transform_indices = @transform_1, window_bounds = array<i64: 4, 8, 384>}, {}, {}, {transform_indices = @transform_4, window_bounds = array<i64: 4, 8, 128>}, {transform_indices = @transform_5, window_bounds = array<i64: 4, 8, 128>}]} {
    %c0_i32 = arith.constant 0 : i32
    %0 = arith.cmpi eq, %arg0, %c0_i32 : i32
    %1 = arith.extui %0 : i1 to i32
    %c0_i32_0 = arith.constant 0 : i32
    %2 = arith.cmpi ne, %1, %c0_i32_0 : i32
    scf.if %2 {
      %cst_79 = arith.constant 0.000000e+00 : f32
      %283 = vector.broadcast %cst_79 : f32 to vector<8x128xf32>
      %c0_80 = arith.constant 0 : index
      %c0_81 = arith.constant 0 : index
      %284 = vector.load %arg9[%c0_80, %c0_81] : memref<8x128xf32, #tpu.memory_space<vmem>>, vector<8x128xf32>
      tpu.vector_store %arg9[%c0_80, %c0_81], %283 {strides = array<i32>} : memref<8x128xf32, #tpu.memory_space<vmem>>, vector<8x128xf32>,
      %cst_82 = arith.constant 0.000000e+00 : f32
      %285 = vector.broadcast %cst_82 : f32 to vector<8x128xf32>
      %c0_83 = arith.constant 0 : index
      %c0_84 = arith.constant 0 : index
      %286 = vector.load %arg10[%c0_83, %c0_84] : memref<8x128xf32, #tpu.memory_space<vmem>>, vector<8x128xf32>
      tpu.vector_store %arg10[%c0_83, %c0_84], %285 {strides = array<i32>} : memref<8x128xf32, #tpu.memory_space<vmem>>, vector<8x128xf32>,
      %c0_i32_85 = arith.constant 0 : i32
      %287 = tpu.memref_slice %arg11[%c0_i32_85] : memref<2x!tpu.dma_semaphore, #tpu.memory_space<semaphore_mem>> -> memref<1x!tpu.dma_semaphore, #tpu.memory_space<semaphore_mem>>
      %288 = tpu.memref_squeeze %287 : memref<1x!tpu.dma_semaphore, #tpu.memory_space<semaphore_mem>> -> memref<!tpu.dma_semaphore, #tpu.memory_space<semaphore_mem>>
      tpu.enqueue_dma source(%arg3 : memref<2x128x384xf32, #tpu.memory_space<any>>) target(%arg7 : memref<2x128x384xf32, #tpu.memory_space<vmem>>) target_semaphore(%288 : memref<!tpu.dma_semaphore, #tpu.memory_space<semaphore_mem>>)
      %c1_i32_86 = arith.constant 1 : i32
      %289 = tpu.memref_slice %arg11[%c1_i32_86] : memref<2x!tpu.dma_semaphore, #tpu.memory_space<semaphore_mem>> -> memref<1x!tpu.dma_semaphore, #tpu.memory_space<semaphore_mem>>
      %290 = tpu.memref_squeeze %289 : memref<1x!tpu.dma_semaphore, #tpu.memory_space<semaphore_mem>> -> memref<!tpu.dma_semaphore, #tpu.memory_space<semaphore_mem>>
      tpu.enqueue_dma source(%arg4 : memref<2x8x128xf32, #tpu.memory_space<any>>) target(%arg8 : memref<2x8x128xf32, #tpu.memory_space<vmem>>) target_semaphore(%290 : memref<!tpu.dma_semaphore, #tpu.memory_space<semaphore_mem>>)
      %c0_i32_87 = arith.constant 0 : i32
      %291 = tpu.memref_slice %arg11[%c0_i32_87] : memref<2x!tpu.dma_semaphore, #tpu.memory_space<semaphore_mem>> -> memref<1x!tpu.dma_semaphore, #tpu.memory_space<semaphore_mem>>
      %292 = tpu.memref_squeeze %291 : memref<1x!tpu.dma_semaphore, #tpu.memory_space<semaphore_mem>> -> memref<!tpu.dma_semaphore, #tpu.memory_space<semaphore_mem>>
      tpu.wait_dma2 semaphore(%292 : memref<!tpu.dma_semaphore, #tpu.memory_space<semaphore_mem>>) src(%arg3 : memref<2x128x384xf32, #tpu.memory_space<any>>) dst(%arg7 : memref<2x128x384xf32, #tpu.memory_space<vmem>>)
      %c1_i32_88 = arith.constant 1 : i32
      %293 = tpu.memref_slice %arg11[%c1_i32_88] : memref<2x!tpu.dma_semaphore, #tpu.memory_space<semaphore_mem>> -> memref<1x!tpu.dma_semaphore, #tpu.memory_space<semaphore_mem>>
      %294 = tpu.memref_squeeze %293 : memref<1x!tpu.dma_semaphore, #tpu.memory_space<semaphore_mem>> -> memref<!tpu.dma_semaphore, #tpu.memory_space<semaphore_mem>>
      tpu.wait_dma2 semaphore(%294 : memref<!tpu.dma_semaphore, #tpu.memory_space<semaphore_mem>>) src(%arg4 : memref<2x8x128xf32, #tpu.memory_space<any>>) dst(%arg8 : memref<2x8x128xf32, #tpu.memory_space<vmem>>)
    } else {
    }
    %c0 = arith.constant 0 : index
    %c0_1 = arith.constant 0 : index
    %c0_2 = arith.constant 0 : index
    %3 = vector.load %arg7[%c0, %c0_1, %c0_2] : memref<2x128x384xf32, #tpu.memory_space<vmem>>, vector<1x128x384xf32>
    %4 = vector.shape_cast %3 : vector<1x128x384xf32> to vector<128x384xf32>
    %c1 = arith.constant 1 : index
    %c0_3 = arith.constant 0 : index
    %c0_4 = arith.constant 0 : index
    %5 = vector.load %arg7[%c1, %c0_3, %c0_4] : memref<2x128x384xf32, #tpu.memory_space<vmem>>, vector<1x128x384xf32>
    %6 = vector.shape_cast %5 : vector<1x128x384xf32> to vector<128x384xf32>
    %c0_5 = arith.constant 0 : index
    %c0_6 = arith.constant 0 : index
    %c0_7 = arith.constant 0 : index
    %7 = vector.load %arg8[%c0_5, %c0_6, %c0_7] : memref<2x8x128xf32, #tpu.memory_space<vmem>>, vector<1x8x128xf32>
    %8 = vector.shape_cast %7 : vector<1x8x128xf32> to vector<8x128xf32>
    %c1_8 = arith.constant 1 : index
    %c0_9 = arith.constant 0 : index
    %c0_10 = arith.constant 0 : index
    %9 = vector.load %arg8[%c1_8, %c0_9, %c0_10] : memref<2x8x128xf32, #tpu.memory_space<vmem>>, vector<1x8x128xf32>
    %10 = vector.shape_cast %9 : vector<1x8x128xf32> to vector<8x128xf32>
    %c0_11 = arith.constant 0 : index
    %c0_12 = arith.constant 0 : index
    %11 = vector.load %arg9[%c0_11, %c0_12] : memref<8x128xf32, #tpu.memory_space<vmem>>, vector<8x128xf32>
    %c0_13 = arith.constant 0 : index
    %c0_14 = arith.constant 0 : index
    %12 = vector.load %arg10[%c0_13, %c0_14] : memref<8x128xf32, #tpu.memory_space<vmem>>, vector<8x128xf32>
    %c0_i32_15 = arith.constant 0 : i32
    %13 = arith.index_cast %c0_i32_15 : i32 to index
    %c0_16 = arith.constant 0 : index
    %c0_17 = arith.constant 0 : index
    %14 = vector.load %arg1[%13, %c0_16, %c0_17] : memref<4x8x384xf32, #tpu.memory_space<vmem>>, vector<1x8x384xf32>
    %15 = vector.shape_cast %14 : vector<1x8x384xf32> to vector<8x384xf32>
    %cst = arith.constant dense<0.000000e+00> : vector<8x384xf32>
    %16 = tpu.matmul %11, %4, %cst {dimension_numbers = #tpu.dot_dimension_numbers<[1], [0], [0], [1], [0, 0, 1, 1], [], []>} : vector<8x128xf32>, vector<128x384xf32>, vector<8x384xf32> -> vector<8x384xf32>
    %17 = vector.extract_strided_slice %15 {offsets = [0, 0], sizes = [8, 128], strides = [1, 1]} : vector<8x384xf32> to vector<8x128xf32>
    %18 = vector.extract_strided_slice %16 {offsets = [0, 0], sizes = [8, 128], strides = [1, 1]} : vector<8x384xf32> to vector<8x128xf32>
    %19 = arith.addf %17, %18 : vector<8x128xf32>
    %20 = arith.negf %19 : vector<8x128xf32>
    %21 = math.exp %20 : vector<8x128xf32>
    %cst_18 = arith.constant 1.000000e+00 : f32
    %22 = vector.broadcast %cst_18 : f32 to vector<8x128xf32>
    %23 = arith.addf %22, %21 : vector<8x128xf32>
    %24 = arith.divf %22, %23 : vector<8x128xf32>
    %25 = vector.extract_strided_slice %15 {offsets = [0, 128], sizes = [8, 128], strides = [1, 1]} : vector<8x384xf32> to vector<8x128xf32>
    %26 = vector.extract_strided_slice %16 {offsets = [0, 128], sizes = [8, 128], strides = [1, 1]} : vector<8x384xf32> to vector<8x128xf32>
    %27 = arith.addf %25, %26 : vector<8x128xf32>
    %28 = arith.negf %27 : vector<8x128xf32>
    %29 = math.exp %28 : vector<8x128xf32>
    %cst_19 = arith.constant 1.000000e+00 : f32
    %30 = vector.broadcast %cst_19 : f32 to vector<8x128xf32>
    %31 = arith.addf %30, %29 : vector<8x128xf32>
    %32 = arith.divf %30, %31 : vector<8x128xf32>
    %33 = vector.extract_strided_slice %15 {offsets = [0, 256], sizes = [8, 128], strides = [1, 1]} : vector<8x384xf32> to vector<8x128xf32>
    %34 = vector.extract_strided_slice %16 {offsets = [0, 256], sizes = [8, 128], strides = [1, 1]} : vector<8x384xf32> to vector<8x128xf32>
    %35 = arith.addf %34, %8 : vector<8x128xf32>
    %36 = arith.mulf %24, %35 : vector<8x128xf32>
    %37 = arith.addf %33, %36 : vector<8x128xf32>
    %38 = math.tanh %37 : vector<8x128xf32>
    %39 = arith.subf %11, %38 : vector<8x128xf32>
    %40 = arith.mulf %32, %39 : vector<8x128xf32>
    %41 = arith.addf %38, %40 : vector<8x128xf32>
    %42 = arith.index_cast %c0_i32_15 : i32 to index
    %c0_20 = arith.constant 0 : index
    %c0_21 = arith.constant 0 : index
    %43 = vector.load %arg5[%42, %c0_20, %c0_21] : memref<4x8x128xf32, #tpu.memory_space<vmem>>, vector<1x8x128xf32>
    %44 = vector.shape_cast %43 : vector<1x8x128xf32> to vector<8x128xf32>
    %45 = vector.shape_cast %41 : vector<8x128xf32> to vector<1x8x128xf32>
    tpu.vector_store %arg5[%42, %c0_20, %c0_21], %45 {strides = array<i32>} : memref<4x8x128xf32, #tpu.memory_space<vmem>>, vector<1x8x128xf32>,
    %c3_i32 = arith.constant 3 : i32
    %46 = arith.subi %c3_i32, %c0_i32_15 : i32
    %47 = arith.index_cast %46 : i32 to index
    %c0_22 = arith.constant 0 : index
    %c0_23 = arith.constant 0 : index
    %48 = vector.load %arg2[%47, %c0_22, %c0_23] : memref<4x8x384xf32, #tpu.memory_space<vmem>>, vector<1x8x384xf32>
    %49 = vector.shape_cast %48 : vector<1x8x384xf32> to vector<8x384xf32>
    %cst_24 = arith.constant dense<0.000000e+00> : vector<8x384xf32>
    %50 = tpu.matmul %12, %6, %cst_24 {dimension_numbers = #tpu.dot_dimension_numbers<[1], [0], [0], [1], [0, 0, 1, 1], [], []>} : vector<8x128xf32>, vector<128x384xf32>, vector<8x384xf32> -> vector<8x384xf32>
    %51 = vector.extract_strided_slice %49 {offsets = [0, 0], sizes = [8, 128], strides = [1, 1]} : vector<8x384xf32> to vector<8x128xf32>
    %52 = vector.extract_strided_slice %50 {offsets = [0, 0], sizes = [8, 128], strides = [1, 1]} : vector<8x384xf32> to vector<8x128xf32>
    %53 = arith.addf %51, %52 : vector<8x128xf32>
    %54 = arith.negf %53 : vector<8x128xf32>
    %55 = math.exp %54 : vector<8x128xf32>
    %cst_25 = arith.constant 1.000000e+00 : f32
    %56 = vector.broadcast %cst_25 : f32 to vector<8x128xf32>
    %57 = arith.addf %56, %55 : vector<8x128xf32>
    %58 = arith.divf %56, %57 : vector<8x128xf32>
    %59 = vector.extract_strided_slice %49 {offsets = [0, 128], sizes = [8, 128], strides = [1, 1]} : vector<8x384xf32> to vector<8x128xf32>
    %60 = vector.extract_strided_slice %50 {offsets = [0, 128], sizes = [8, 128], strides = [1, 1]} : vector<8x384xf32> to vector<8x128xf32>
    %61 = arith.addf %59, %60 : vector<8x128xf32>
    %62 = arith.negf %61 : vector<8x128xf32>
    %63 = math.exp %62 : vector<8x128xf32>
    %cst_26 = arith.constant 1.000000e+00 : f32
    %64 = vector.broadcast %cst_26 : f32 to vector<8x128xf32>
    %65 = arith.addf %64, %63 : vector<8x128xf32>
    %66 = arith.divf %64, %65 : vector<8x128xf32>
    %67 = vector.extract_strided_slice %49 {offsets = [0, 256], sizes = [8, 128], strides = [1, 1]} : vector<8x384xf32> to vector<8x128xf32>
    %68 = vector.extract_strided_slice %50 {offsets = [0, 256], sizes = [8, 128], strides = [1, 1]} : vector<8x384xf32> to vector<8x128xf32>
    %69 = arith.addf %68, %10 : vector<8x128xf32>
    %70 = arith.mulf %58, %69 : vector<8x128xf32>
    %71 = arith.addf %67, %70 : vector<8x128xf32>
    %72 = math.tanh %71 : vector<8x128xf32>
    %73 = arith.subf %12, %72 : vector<8x128xf32>
    %74 = arith.mulf %66, %73 : vector<8x128xf32>
    %75 = arith.addf %72, %74 : vector<8x128xf32>
    %76 = arith.index_cast %46 : i32 to index
    %c0_27 = arith.constant 0 : index
    %c0_28 = arith.constant 0 : index
    %77 = vector.load %arg6[%76, %c0_27, %c0_28] : memref<4x8x128xf32, #tpu.memory_space<vmem>>, vector<1x8x128xf32>
    %78 = vector.shape_cast %77 : vector<1x8x128xf32> to vector<8x128xf32>
    %79 = vector.shape_cast %75 : vector<8x128xf32> to vector<1x8x128xf32>
    tpu.vector_store %arg6[%76, %c0_27, %c0_28], %79 {strides = array<i32>} : memref<4x8x128xf32, #tpu.memory_space<vmem>>, vector<1x8x128xf32>,
    %c1_i32 = arith.constant 1 : i32
    %80 = arith.index_cast %c1_i32 : i32 to index
    %c0_29 = arith.constant 0 : index
    %c0_30 = arith.constant 0 : index
    %81 = vector.load %arg1[%80, %c0_29, %c0_30] : memref<4x8x384xf32, #tpu.memory_space<vmem>>, vector<1x8x384xf32>
    %82 = vector.shape_cast %81 : vector<1x8x384xf32> to vector<8x384xf32>
    %cst_31 = arith.constant dense<0.000000e+00> : vector<8x384xf32>
    %83 = tpu.matmul %41, %4, %cst_31 {dimension_numbers = #tpu.dot_dimension_numbers<[1], [0], [0], [1], [0, 0, 1, 1], [], []>} : vector<8x128xf32>, vector<128x384xf32>, vector<8x384xf32> -> vector<8x384xf32>
    %84 = vector.extract_strided_slice %82 {offsets = [0, 0], sizes = [8, 128], strides = [1, 1]} : vector<8x384xf32> to vector<8x128xf32>
    %85 = vector.extract_strided_slice %83 {offsets = [0, 0], sizes = [8, 128], strides = [1, 1]} : vector<8x384xf32> to vector<8x128xf32>
    %86 = arith.addf %84, %85 : vector<8x128xf32>
    %87 = arith.negf %86 : vector<8x128xf32>
    %88 = math.exp %87 : vector<8x128xf32>
    %cst_32 = arith.constant 1.000000e+00 : f32
    %89 = vector.broadcast %cst_32 : f32 to vector<8x128xf32>
    %90 = arith.addf %89, %88 : vector<8x128xf32>
    %91 = arith.divf %89, %90 : vector<8x128xf32>
    %92 = vector.extract_strided_slice %82 {offsets = [0, 128], sizes = [8, 128], strides = [1, 1]} : vector<8x384xf32> to vector<8x128xf32>
    %93 = vector.extract_strided_slice %83 {offsets = [0, 128], sizes = [8, 128], strides = [1, 1]} : vector<8x384xf32> to vector<8x128xf32>
    %94 = arith.addf %92, %93 : vector<8x128xf32>
    %95 = arith.negf %94 : vector<8x128xf32>
    %96 = math.exp %95 : vector<8x128xf32>
    %cst_33 = arith.constant 1.000000e+00 : f32
    %97 = vector.broadcast %cst_33 : f32 to vector<8x128xf32>
    %98 = arith.addf %97, %96 : vector<8x128xf32>
    %99 = arith.divf %97, %98 : vector<8x128xf32>
    %100 = vector.extract_strided_slice %82 {offsets = [0, 256], sizes = [8, 128], strides = [1, 1]} : vector<8x384xf32> to vector<8x128xf32>
    %101 = vector.extract_strided_slice %83 {offsets = [0, 256], sizes = [8, 128], strides = [1, 1]} : vector<8x384xf32> to vector<8x128xf32>
    %102 = arith.addf %101, %8 : vector<8x128xf32>
    %103 = arith.mulf %91, %102 : vector<8x128xf32>
    %104 = arith.addf %100, %103 : vector<8x128xf32>
    %105 = math.tanh %104 : vector<8x128xf32>
    %106 = arith.subf %41, %105 : vector<8x128xf32>
    %107 = arith.mulf %99, %106 : vector<8x128xf32>
    %108 = arith.addf %105, %107 : vector<8x128xf32>
    %109 = arith.index_cast %c1_i32 : i32 to index
    %c0_34 = arith.constant 0 : index
    %c0_35 = arith.constant 0 : index
    %110 = vector.load %arg5[%109, %c0_34, %c0_35] : memref<4x8x128xf32, #tpu.memory_space<vmem>>, vector<1x8x128xf32>
    %111 = vector.shape_cast %110 : vector<1x8x128xf32> to vector<8x128xf32>
    %112 = vector.shape_cast %108 : vector<8x128xf32> to vector<1x8x128xf32>
    tpu.vector_store %arg5[%109, %c0_34, %c0_35], %112 {strides = array<i32>} : memref<4x8x128xf32, #tpu.memory_space<vmem>>, vector<1x8x128xf32>,
    %c3_i32_36 = arith.constant 3 : i32
    %113 = arith.subi %c3_i32_36, %c1_i32 : i32
    %114 = arith.index_cast %113 : i32 to index
    %c0_37 = arith.constant 0 : index
    %c0_38 = arith.constant 0 : index
    %115 = vector.load %arg2[%114, %c0_37, %c0_38] : memref<4x8x384xf32, #tpu.memory_space<vmem>>, vector<1x8x384xf32>
    %116 = vector.shape_cast %115 : vector<1x8x384xf32> to vector<8x384xf32>
    %cst_39 = arith.constant dense<0.000000e+00> : vector<8x384xf32>
    %117 = tpu.matmul %75, %6, %cst_39 {dimension_numbers = #tpu.dot_dimension_numbers<[1], [0], [0], [1], [0, 0, 1, 1], [], []>} : vector<8x128xf32>, vector<128x384xf32>, vector<8x384xf32> -> vector<8x384xf32>
    %118 = vector.extract_strided_slice %116 {offsets = [0, 0], sizes = [8, 128], strides = [1, 1]} : vector<8x384xf32> to vector<8x128xf32>
    %119 = vector.extract_strided_slice %117 {offsets = [0, 0], sizes = [8, 128], strides = [1, 1]} : vector<8x384xf32> to vector<8x128xf32>
    %120 = arith.addf %118, %119 : vector<8x128xf32>
    %121 = arith.negf %120 : vector<8x128xf32>
    %122 = math.exp %121 : vector<8x128xf32>
    %cst_40 = arith.constant 1.000000e+00 : f32
    %123 = vector.broadcast %cst_40 : f32 to vector<8x128xf32>
    %124 = arith.addf %123, %122 : vector<8x128xf32>
    %125 = arith.divf %123, %124 : vector<8x128xf32>
    %126 = vector.extract_strided_slice %116 {offsets = [0, 128], sizes = [8, 128], strides = [1, 1]} : vector<8x384xf32> to vector<8x128xf32>
    %127 = vector.extract_strided_slice %117 {offsets = [0, 128], sizes = [8, 128], strides = [1, 1]} : vector<8x384xf32> to vector<8x128xf32>
    %128 = arith.addf %126, %127 : vector<8x128xf32>
    %129 = arith.negf %128 : vector<8x128xf32>
    %130 = math.exp %129 : vector<8x128xf32>
    %cst_41 = arith.constant 1.000000e+00 : f32
    %131 = vector.broadcast %cst_41 : f32 to vector<8x128xf32>
    %132 = arith.addf %131, %130 : vector<8x128xf32>
    %133 = arith.divf %131, %132 : vector<8x128xf32>
    %134 = vector.extract_strided_slice %116 {offsets = [0, 256], sizes = [8, 128], strides = [1, 1]} : vector<8x384xf32> to vector<8x128xf32>
    %135 = vector.extract_strided_slice %117 {offsets = [0, 256], sizes = [8, 128], strides = [1, 1]} : vector<8x384xf32> to vector<8x128xf32>
    %136 = arith.addf %135, %10 : vector<8x128xf32>
    %137 = arith.mulf %125, %136 : vector<8x128xf32>
    %138 = arith.addf %134, %137 : vector<8x128xf32>
    %139 = math.tanh %138 : vector<8x128xf32>
    %140 = arith.subf %75, %139 : vector<8x128xf32>
    %141 = arith.mulf %133, %140 : vector<8x128xf32>
    %142 = arith.addf %139, %141 : vector<8x128xf32>
    %143 = arith.index_cast %113 : i32 to index
    %c0_42 = arith.constant 0 : index
    %c0_43 = arith.constant 0 : index
    %144 = vector.load %arg6[%143, %c0_42, %c0_43] : memref<4x8x128xf32, #tpu.memory_space<vmem>>, vector<1x8x128xf32>
    %145 = vector.shape_cast %144 : vector<1x8x128xf32> to vector<8x128xf32>
    %146 = vector.shape_cast %142 : vector<8x128xf32> to vector<1x8x128xf32>
    tpu.vector_store %arg6[%143, %c0_42, %c0_43], %146 {strides = array<i32>} : memref<4x8x128xf32, #tpu.memory_space<vmem>>, vector<1x8x128xf32>,
    %c2_i32 = arith.constant 2 : i32
    %147 = arith.index_cast %c2_i32 : i32 to index
    %c0_44 = arith.constant 0 : index
    %c0_45 = arith.constant 0 : index
    %148 = vector.load %arg1[%147, %c0_44, %c0_45] : memref<4x8x384xf32, #tpu.memory_space<vmem>>, vector<1x8x384xf32>
    %149 = vector.shape_cast %148 : vector<1x8x384xf32> to vector<8x384xf32>
    %cst_46 = arith.constant dense<0.000000e+00> : vector<8x384xf32>
    %150 = tpu.matmul %108, %4, %cst_46 {dimension_numbers = #tpu.dot_dimension_numbers<[1], [0], [0], [1], [0, 0, 1, 1], [], []>} : vector<8x128xf32>, vector<128x384xf32>, vector<8x384xf32> -> vector<8x384xf32>
    %151 = vector.extract_strided_slice %149 {offsets = [0, 0], sizes = [8, 128], strides = [1, 1]} : vector<8x384xf32> to vector<8x128xf32>
    %152 = vector.extract_strided_slice %150 {offsets = [0, 0], sizes = [8, 128], strides = [1, 1]} : vector<8x384xf32> to vector<8x128xf32>
    %153 = arith.addf %151, %152 : vector<8x128xf32>
    %154 = arith.negf %153 : vector<8x128xf32>
    %155 = math.exp %154 : vector<8x128xf32>
    %cst_47 = arith.constant 1.000000e+00 : f32
    %156 = vector.broadcast %cst_47 : f32 to vector<8x128xf32>
    %157 = arith.addf %156, %155 : vector<8x128xf32>
    %158 = arith.divf %156, %157 : vector<8x128xf32>
    %159 = vector.extract_strided_slice %149 {offsets = [0, 128], sizes = [8, 128], strides = [1, 1]} : vector<8x384xf32> to vector<8x128xf32>
    %160 = vector.extract_strided_slice %150 {offsets = [0, 128], sizes = [8, 128], strides = [1, 1]} : vector<8x384xf32> to vector<8x128xf32>
    %161 = arith.addf %159, %160 : vector<8x128xf32>
    %162 = arith.negf %161 : vector<8x128xf32>
    %163 = math.exp %162 : vector<8x128xf32>
    %cst_48 = arith.constant 1.000000e+00 : f32
    %164 = vector.broadcast %cst_48 : f32 to vector<8x128xf32>
    %165 = arith.addf %164, %163 : vector<8x128xf32>
    %166 = arith.divf %164, %165 : vector<8x128xf32>
    %167 = vector.extract_strided_slice %149 {offsets = [0, 256], sizes = [8, 128], strides = [1, 1]} : vector<8x384xf32> to vector<8x128xf32>
    %168 = vector.extract_strided_slice %150 {offsets = [0, 256], sizes = [8, 128], strides = [1, 1]} : vector<8x384xf32> to vector<8x128xf32>
    %169 = arith.addf %168, %8 : vector<8x128xf32>
    %170 = arith.mulf %158, %169 : vector<8x128xf32>
    %171 = arith.addf %167, %170 : vector<8x128xf32>
    %172 = math.tanh %171 : vector<8x128xf32>
    %173 = arith.subf %108, %172 : vector<8x128xf32>
    %174 = arith.mulf %166, %173 : vector<8x128xf32>
    %175 = arith.addf %172, %174 : vector<8x128xf32>
    %176 = arith.index_cast %c2_i32 : i32 to index
    %c0_49 = arith.constant 0 : index
    %c0_50 = arith.constant 0 : index
    %177 = vector.load %arg5[%176, %c0_49, %c0_50] : memref<4x8x128xf32, #tpu.memory_space<vmem>>, vector<1x8x128xf32>
    %178 = vector.shape_cast %177 : vector<1x8x128xf32> to vector<8x128xf32>
    %179 = vector.shape_cast %175 : vector<8x128xf32> to vector<1x8x128xf32>
    tpu.vector_store %arg5[%176, %c0_49, %c0_50], %179 {strides = array<i32>} : memref<4x8x128xf32, #tpu.memory_space<vmem>>, vector<1x8x128xf32>,
    %c3_i32_51 = arith.constant 3 : i32
    %180 = arith.subi %c3_i32_51, %c2_i32 : i32
    %181 = arith.index_cast %180 : i32 to index
    %c0_52 = arith.constant 0 : index
    %c0_53 = arith.constant 0 : index
    %182 = vector.load %arg2[%181, %c0_52, %c0_53] : memref<4x8x384xf32, #tpu.memory_space<vmem>>, vector<1x8x384xf32>
    %183 = vector.shape_cast %182 : vector<1x8x384xf32> to vector<8x384xf32>
    %cst_54 = arith.constant dense<0.000000e+00> : vector<8x384xf32>
    %184 = tpu.matmul %142, %6, %cst_54 {dimension_numbers = #tpu.dot_dimension_numbers<[1], [0], [0], [1], [0, 0, 1, 1], [], []>} : vector<8x128xf32>, vector<128x384xf32>, vector<8x384xf32> -> vector<8x384xf32>
    %185 = vector.extract_strided_slice %183 {offsets = [0, 0], sizes = [8, 128], strides = [1, 1]} : vector<8x384xf32> to vector<8x128xf32>
    %186 = vector.extract_strided_slice %184 {offsets = [0, 0], sizes = [8, 128], strides = [1, 1]} : vector<8x384xf32> to vector<8x128xf32>
    %187 = arith.addf %185, %186 : vector<8x128xf32>
    %188 = arith.negf %187 : vector<8x128xf32>
    %189 = math.exp %188 : vector<8x128xf32>
    %cst_55 = arith.constant 1.000000e+00 : f32
    %190 = vector.broadcast %cst_55 : f32 to vector<8x128xf32>
    %191 = arith.addf %190, %189 : vector<8x128xf32>
    %192 = arith.divf %190, %191 : vector<8x128xf32>
    %193 = vector.extract_strided_slice %183 {offsets = [0, 128], sizes = [8, 128], strides = [1, 1]} : vector<8x384xf32> to vector<8x128xf32>
    %194 = vector.extract_strided_slice %184 {offsets = [0, 128], sizes = [8, 128], strides = [1, 1]} : vector<8x384xf32> to vector<8x128xf32>
    %195 = arith.addf %193, %194 : vector<8x128xf32>
    %196 = arith.negf %195 : vector<8x128xf32>
    %197 = math.exp %196 : vector<8x128xf32>
    %cst_56 = arith.constant 1.000000e+00 : f32
    %198 = vector.broadcast %cst_56 : f32 to vector<8x128xf32>
    %199 = arith.addf %198, %197 : vector<8x128xf32>
    %200 = arith.divf %198, %199 : vector<8x128xf32>
    %201 = vector.extract_strided_slice %183 {offsets = [0, 256], sizes = [8, 128], strides = [1, 1]} : vector<8x384xf32> to vector<8x128xf32>
    %202 = vector.extract_strided_slice %184 {offsets = [0, 256], sizes = [8, 128], strides = [1, 1]} : vector<8x384xf32> to vector<8x128xf32>
    %203 = arith.addf %202, %10 : vector<8x128xf32>
    %204 = arith.mulf %192, %203 : vector<8x128xf32>
    %205 = arith.addf %201, %204 : vector<8x128xf32>
    %206 = math.tanh %205 : vector<8x128xf32>
    %207 = arith.subf %142, %206 : vector<8x128xf32>
    %208 = arith.mulf %200, %207 : vector<8x128xf32>
    %209 = arith.addf %206, %208 : vector<8x128xf32>
    %210 = arith.index_cast %180 : i32 to index
    %c0_57 = arith.constant 0 : index
    %c0_58 = arith.constant 0 : index
    %211 = vector.load %arg6[%210, %c0_57, %c0_58] : memref<4x8x128xf32, #tpu.memory_space<vmem>>, vector<1x8x128xf32>
    %212 = vector.shape_cast %211 : vector<1x8x128xf32> to vector<8x128xf32>
    %213 = vector.shape_cast %209 : vector<8x128xf32> to vector<1x8x128xf32>
    tpu.vector_store %arg6[%210, %c0_57, %c0_58], %213 {strides = array<i32>} : memref<4x8x128xf32, #tpu.memory_space<vmem>>, vector<1x8x128xf32>,
    %c3_i32_59 = arith.constant 3 : i32
    %214 = arith.index_cast %c3_i32_59 : i32 to index
    %c0_60 = arith.constant 0 : index
    %c0_61 = arith.constant 0 : index
    %215 = vector.load %arg1[%214, %c0_60, %c0_61] : memref<4x8x384xf32, #tpu.memory_space<vmem>>, vector<1x8x384xf32>
    %216 = vector.shape_cast %215 : vector<1x8x384xf32> to vector<8x384xf32>
    %cst_62 = arith.constant dense<0.000000e+00> : vector<8x384xf32>
    %217 = tpu.matmul %175, %4, %cst_62 {dimension_numbers = #tpu.dot_dimension_numbers<[1], [0], [0], [1], [0, 0, 1, 1], [], []>} : vector<8x128xf32>, vector<128x384xf32>, vector<8x384xf32> -> vector<8x384xf32>
    %218 = vector.extract_strided_slice %216 {offsets = [0, 0], sizes = [8, 128], strides = [1, 1]} : vector<8x384xf32> to vector<8x128xf32>
    %219 = vector.extract_strided_slice %217 {offsets = [0, 0], sizes = [8, 128], strides = [1, 1]} : vector<8x384xf32> to vector<8x128xf32>
    %220 = arith.addf %218, %219 : vector<8x128xf32>
    %221 = arith.negf %220 : vector<8x128xf32>
    %222 = math.exp %221 : vector<8x128xf32>
    %cst_63 = arith.constant 1.000000e+00 : f32
    %223 = vector.broadcast %cst_63 : f32 to vector<8x128xf32>
    %224 = arith.addf %223, %222 : vector<8x128xf32>
    %225 = arith.divf %223, %224 : vector<8x128xf32>
    %226 = vector.extract_strided_slice %216 {offsets = [0, 128], sizes = [8, 128], strides = [1, 1]} : vector<8x384xf32> to vector<8x128xf32>
    %227 = vector.extract_strided_slice %217 {offsets = [0, 128], sizes = [8, 128], strides = [1, 1]} : vector<8x384xf32> to vector<8x128xf32>
    %228 = arith.addf %226, %227 : vector<8x128xf32>
    %229 = arith.negf %228 : vector<8x128xf32>
    %230 = math.exp %229 : vector<8x128xf32>
    %cst_64 = arith.constant 1.000000e+00 : f32
    %231 = vector.broadcast %cst_64 : f32 to vector<8x128xf32>
    %232 = arith.addf %231, %230 : vector<8x128xf32>
    %233 = arith.divf %231, %232 : vector<8x128xf32>
    %234 = vector.extract_strided_slice %216 {offsets = [0, 256], sizes = [8, 128], strides = [1, 1]} : vector<8x384xf32> to vector<8x128xf32>
    %235 = vector.extract_strided_slice %217 {offsets = [0, 256], sizes = [8, 128], strides = [1, 1]} : vector<8x384xf32> to vector<8x128xf32>
    %236 = arith.addf %235, %8 : vector<8x128xf32>
    %237 = arith.mulf %225, %236 : vector<8x128xf32>
    %238 = arith.addf %234, %237 : vector<8x128xf32>
    %239 = math.tanh %238 : vector<8x128xf32>
    %240 = arith.subf %175, %239 : vector<8x128xf32>
    %241 = arith.mulf %233, %240 : vector<8x128xf32>
    %242 = arith.addf %239, %241 : vector<8x128xf32>
    %243 = arith.index_cast %c3_i32_59 : i32 to index
    %c0_65 = arith.constant 0 : index
    %c0_66 = arith.constant 0 : index
    %244 = vector.load %arg5[%243, %c0_65, %c0_66] : memref<4x8x128xf32, #tpu.memory_space<vmem>>, vector<1x8x128xf32>
    %245 = vector.shape_cast %244 : vector<1x8x128xf32> to vector<8x128xf32>
    %246 = vector.shape_cast %242 : vector<8x128xf32> to vector<1x8x128xf32>
    tpu.vector_store %arg5[%243, %c0_65, %c0_66], %246 {strides = array<i32>} : memref<4x8x128xf32, #tpu.memory_space<vmem>>, vector<1x8x128xf32>,
    %c3_i32_67 = arith.constant 3 : i32
    %247 = arith.subi %c3_i32_67, %c3_i32_59 : i32
    %248 = arith.index_cast %247 : i32 to index
    %c0_68 = arith.constant 0 : index
    %c0_69 = arith.constant 0 : index
    %249 = vector.load %arg2[%248, %c0_68, %c0_69] : memref<4x8x384xf32, #tpu.memory_space<vmem>>, vector<1x8x384xf32>
    %250 = vector.shape_cast %249 : vector<1x8x384xf32> to vector<8x384xf32>
    %cst_70 = arith.constant dense<0.000000e+00> : vector<8x384xf32>
    %251 = tpu.matmul %209, %6, %cst_70 {dimension_numbers = #tpu.dot_dimension_numbers<[1], [0], [0], [1], [0, 0, 1, 1], [], []>} : vector<8x128xf32>, vector<128x384xf32>, vector<8x384xf32> -> vector<8x384xf32>
    %252 = vector.extract_strided_slice %250 {offsets = [0, 0], sizes = [8, 128], strides = [1, 1]} : vector<8x384xf32> to vector<8x128xf32>
    %253 = vector.extract_strided_slice %251 {offsets = [0, 0], sizes = [8, 128], strides = [1, 1]} : vector<8x384xf32> to vector<8x128xf32>
    %254 = arith.addf %252, %253 : vector<8x128xf32>
    %255 = arith.negf %254 : vector<8x128xf32>
    %256 = math.exp %255 : vector<8x128xf32>
    %cst_71 = arith.constant 1.000000e+00 : f32
    %257 = vector.broadcast %cst_71 : f32 to vector<8x128xf32>
    %258 = arith.addf %257, %256 : vector<8x128xf32>
    %259 = arith.divf %257, %258 : vector<8x128xf32>
    %260 = vector.extract_strided_slice %250 {offsets = [0, 128], sizes = [8, 128], strides = [1, 1]} : vector<8x384xf32> to vector<8x128xf32>
    %261 = vector.extract_strided_slice %251 {offsets = [0, 128], sizes = [8, 128], strides = [1, 1]} : vector<8x384xf32> to vector<8x128xf32>
    %262 = arith.addf %260, %261 : vector<8x128xf32>
    %263 = arith.negf %262 : vector<8x128xf32>
    %264 = math.exp %263 : vector<8x128xf32>
    %cst_72 = arith.constant 1.000000e+00 : f32
    %265 = vector.broadcast %cst_72 : f32 to vector<8x128xf32>
    %266 = arith.addf %265, %264 : vector<8x128xf32>
    %267 = arith.divf %265, %266 : vector<8x128xf32>
    %268 = vector.extract_strided_slice %250 {offsets = [0, 256], sizes = [8, 128], strides = [1, 1]} : vector<8x384xf32> to vector<8x128xf32>
    %269 = vector.extract_strided_slice %251 {offsets = [0, 256], sizes = [8, 128], strides = [1, 1]} : vector<8x384xf32> to vector<8x128xf32>
    %270 = arith.addf %269, %10 : vector<8x128xf32>
    %271 = arith.mulf %259, %270 : vector<8x128xf32>
    %272 = arith.addf %268, %271 : vector<8x128xf32>
    %273 = math.tanh %272 : vector<8x128xf32>
    %274 = arith.subf %209, %273 : vector<8x128xf32>
    %275 = arith.mulf %267, %274 : vector<8x128xf32>
    %276 = arith.addf %273, %275 : vector<8x128xf32>
    %277 = arith.index_cast %247 : i32 to index
    %c0_73 = arith.constant 0 : index
    %c0_74 = arith.constant 0 : index
    %278 = vector.load %arg6[%277, %c0_73, %c0_74] : memref<4x8x128xf32, #tpu.memory_space<vmem>>, vector<1x8x128xf32>
    %279 = vector.shape_cast %278 : vector<1x8x128xf32> to vector<8x128xf32>
    %280 = vector.shape_cast %276 : vector<8x128xf32> to vector<1x8x128xf32>
    tpu.vector_store %arg6[%277, %c0_73, %c0_74], %280 {strides = array<i32>} : memref<4x8x128xf32, #tpu.memory_space<vmem>>, vector<1x8x128xf32>,
    %c4_i32 = arith.constant 4 : i32
    %c0_75 = arith.constant 0 : index
    %c0_76 = arith.constant 0 : index
    %281 = vector.load %arg9[%c0_75, %c0_76] : memref<8x128xf32, #tpu.memory_space<vmem>>, vector<8x128xf32>
    tpu.vector_store %arg9[%c0_75, %c0_76], %242 {strides = array<i32>} : memref<8x128xf32, #tpu.memory_space<vmem>>, vector<8x128xf32>,
    %c0_77 = arith.constant 0 : index
    %c0_78 = arith.constant 0 : index
    %282 = vector.load %arg10[%c0_77, %c0_78] : memref<8x128xf32, #tpu.memory_space<vmem>>, vector<8x128xf32>
    tpu.vector_store %arg10[%c0_77, %c0_78], %276 {strides = array<i32>} : memref<8x128xf32, #tpu.memory_space<vmem>>, vector<8x128xf32>,
    return
  }
  func.func @transform_0(%arg0: i32) -> (i32, i32, i32) {
    %c0_i32 = arith.constant 0 : i32
    %c0_i32_0 = arith.constant 0 : i32
    %c0_i32_1 = arith.constant 0 : i32
    return %arg0, %c0_i32, %c0_i32_0 : i32, i32, i32
  }
  func.func @transform_1(%arg0: i32) -> (i32, i32, i32) {
    %c1_i32 = arith.constant 1 : i32
    %0 = arith.subi %c1_i32, %arg0 : i32
    %c0_i32 = arith.constant 0 : i32
    %c0_i32_0 = arith.constant 0 : i32
    %c0_i32_1 = arith.constant 0 : i32
    return %0, %c0_i32, %c0_i32_0 : i32, i32, i32
  }
  func.func @transform_4(%arg0: i32) -> (i32, i32, i32) {
    %c0_i32 = arith.constant 0 : i32
    %c0_i32_0 = arith.constant 0 : i32
    %c0_i32_1 = arith.constant 0 : i32
    return %arg0, %c0_i32, %c0_i32_0 : i32, i32, i32
  }
  func.func @transform_5(%arg0: i32) -> (i32, i32, i32) {
    %c1_i32 = arith.constant 1 : i32
    %0 = arith.subi %c1_i32, %arg0 : i32
    %c0_i32 = arith.constant 0 : i32
    %c0_i32_0 = arith.constant 0 : i32
    %c0_i32_1 = arith.constant 0 : i32
    return %0, %c0_i32, %c0_i32_0 : i32, i32, i32
  }
}

</mosaic_0001>

<bundles_post_ra>
// kernel: mask_gru_forward.1
= control target key start
LH: loop header
LB: loop body
LE: loop exit
PB: predicated region body
PF: predicated region fallthrough
CT: control target
= control target key end

     0   :  { %s3162_s18 = smov 0   ;;  %s3953_s0 = inlined_call_operand.vmem [shape: f32[8,8,384], index: 0, kind: input, shape index: {}]   ;;  %s3954_s1 = inlined_call_operand.vmem [shape: f32[8,8,384], index: 1, kind: input, shape index: {}]   ;;  %s3955_s2 = inlined_call_operand.vmem [shape: f32[2,128,384], index: 2, kind: input, shape index: {}]   ;;  %s3956_s3 = inlined_call_operand.vmem [shape: f32[2,8,128], index: 3, kind: input, shape index: {}]   ;;  %s3957_s4 = inlined_call_operand.vmem [shape: f32[8,8,128], index: 4, kind: output, shape index: {0}]   ;;  %s3958_s5 = inlined_call_operand.vmem [shape: f32[8,8,128], index: 5, kind: output, shape index: {1}]  }
   0x1 LB: > { %s2100_s19 = sadd.s32 4294967295, %s3126_s18   ;;  %p2104_p0 = scmp.ge.s32.totalorder %s3126_s18, 1  ;;  %s3126_s18 = sphi %s3162_s18, %s16_s18  }
   0x2   : > { %p162_p1 = scmp.lt.s32.totalorder %s3126_s18, 3 }
   0x4   : > { %p163_p2 = pnand %p2104_p0, %p162_p1 }
   0x6   : > { %166 = sbr.rel (%p163_p2) target bundleno = 1185 (0x4a1), region = 28 }
   0xd   : > { %s2105_s20 = sshll.u32 %s2100_s19, 2  ;;  %s207_s21 = ssub.s32 1, %s2100_s19 }
   0xe   : > { %p201_p3 = scmp.lt.s32.totalorder %s2105_s20, 7  ;;  %s2107_s22 = sshll.u32 %s207_s21, 2 }
   0xf   : > { %p209_p4 = scmp.lt.s32.totalorder %s2107_s22, 7  ;;  %p2113_p5 = scmp.ne.s32.totalorder %s2100_s19, 0 }
  0x10   : > { %s4005_s20 = smov (!%p201_p3, %s2105_s20), 7  ;;  %v268_v0 = vld [vmem:[%s3955_s2] sm:$0xff] (!%p2113_p5)  ;;  %v270_v1 = vld [vmem:[%s3955_s2 + $0x8] sm:$0xff] (!%p2113_p5)  ;;  %v272_v2 = vld [vmem:[%s3955_s2 + $0x10] sm:$0xff] (!%p2113_p5)  ;;  %v3128_v3 = vmov (!%p2113_p5), 0.0  }
  0x11   : > { %s4007_s22 = smov (!%p209_p4, %s2107_s22), 7  ;;  %s3022_s23 = smul.u32 24, %s4005_s20  ;;  %234 = vst [vmem:[#allocation4] sm:$0xff] (!%p2113_p5), %v3128_v3  ;;  %235 = vst [vmem:[#allocation5] sm:$0xff] (!%p2113_p5), %v3128_v3  ;;  %v274_v4 = vld [vmem:[%s3955_s2 + $0x18] sm:$0xff] (!%p2113_p5)  ;;  %v276_v5 = vld [vmem:[%s3955_s2 + $0x20] sm:$0xff] (!%p2113_p5) }
  0x12   : > { %s2110_s24 = sshll.u32 %s4005_s20, 3  ;;  %s3023_s25 = smul.u32 24, %s4007_s22  ;;  %269 = vst [vmem:[#allocation2] sm:$0xff] (!%p2113_p5), %v268_v0  ;;  %271 = vst [vmem:[#allocation2 + $0x8] sm:$0xff] (!%p2113_p5), %v270_v1  ;;  %v278_v6 = vld [vmem:[%s3955_s2 + $0x28] sm:$0xff] (!%p2113_p5)  ;;  %v280_v7 = vld [vmem:[%s3955_s2 + $0x30] sm:$0xff] (!%p2113_p5) }
  0x13   : > { %s3173_s28 = scalar_lea.vmem %s3957_s4, %s2110_s24  ;;  %s3178_s6 = scalar_lea.vmem %s3953_s0, %s3022_s23  ;;  %273 = vst [vmem:[#allocation2 + $0x10] sm:$0xff] (!%p2113_p5), %v272_v2  ;;  %275 = vst [vmem:[#allocation2 + $0x18] sm:$0xff] (!%p2113_p5), %v274_v4  ;;  %v282_v8 = vld [vmem:[%s3955_s2 + $0x38] sm:$0xff] (!%p2113_p5)  ;;  %v284_v9 = vld [vmem:[%s3955_s2 + $0x40] sm:$0xff] (!%p2113_p5) }
  0x14   : > { %s2112_s7 = sshll.u32 %s4007_s22, 3  ;;  %s3183_s10 = scalar_lea.vmem %s3954_s1, %s3023_s25  ;;  %277 = vst [vmem:[#allocation2 + $0x20] sm:$0xff] (!%p2113_p5), %v276_v5  ;;  %279 = vst [vmem:[#allocation2 + $0x28] sm:$0xff] (!%p2113_p5), %v278_v6  ;;  %v286_v10 = vld [vmem:[%s3955_s2 + $0x48] sm:$0xff] (!%p2113_p5)  ;;  %v288_v11 = vld [vmem:[%s3955_s2 + $0x50] sm:$0xff] (!%p2113_p5) }
  0x15   : > { %s3188_s13 = scalar_lea.vmem %s3958_s5, %s2112_s7  ;;  %233 = sbr.rel (%p2113_p5) target bundleno = 73 (0x49), region = 32  ;;  %281 = vst [vmem:[#allocation2 + $0x30] sm:$0xff] (!%p2113_p5), %v280_v7  ;;  %283 = vst [vmem:[#allocation2 + $0x38] sm:$0xff] (!%p2113_p5), %v282_v8  ;;  %v290_v12 = vld [vmem:[%s3955_s2 + $0x58] sm:$0xff] (!%p2113_p5)  ;;  %v292_v13 = vld [vmem:[%s3955_s2 + $0x60] sm:$0xff] (!%p2113_p5) }
  0x16   : > { %285 = vst [vmem:[#allocation2 + $0x40] sm:$0xff] (!%p2113_p5), %v284_v9  ;;  %287 = vst [vmem:[#allocation2 + $0x48] sm:$0xff] (!%p2113_p5), %v286_v10  ;;  %v294_v14 = vld [vmem:[%s3955_s2 + $0x68] sm:$0xff] (!%p2113_p5)  ;;  %v296_v15 = vld [vmem:[%s3955_s2 + $0x70] sm:$0xff] (!%p2113_p5) }
  0x17   : > { %289 = vst [vmem:[#allocation2 + $0x50] sm:$0xff] (!%p2113_p5), %v288_v11  ;;  %291 = vst [vmem:[#allocation2 + $0x58] sm:$0xff] (!%p2113_p5), %v290_v12  ;;  %v298_v16 = vld [vmem:[%s3955_s2 + $0x78] sm:$0xff] (!%p2113_p5)  ;;  %v300_v17 = vld [vmem:[%s3955_s2 + $0x80] sm:$0xff] (!%p2113_p5) }
  0x18   : > { %293 = vst [vmem:[#allocation2 + $0x60] sm:$0xff] (!%p2113_p5), %v292_v13  ;;  %295 = vst [vmem:[#allocation2 + $0x68] sm:$0xff] (!%p2113_p5), %v294_v14  ;;  %v302_v18 = vld [vmem:[%s3955_s2 + $0x88] sm:$0xff] (!%p2113_p5)  ;;  %v304_v19 = vld [vmem:[%s3955_s2 + $0x90] sm:$0xff] (!%p2113_p5) }
  0x19   : > { %297 = vst [vmem:[#allocation2 + $0x70] sm:$0xff] (!%p2113_p5), %v296_v15  ;;  %299 = vst [vmem:[#allocation2 + $0x78] sm:$0xff] (!%p2113_p5), %v298_v16  ;;  %v306_v20 = vld [vmem:[%s3955_s2 + $0x98] sm:$0xff] (!%p2113_p5)  ;;  %v308_v21 = vld [vmem:[%s3955_s2 + $0xa0] sm:$0xff] (!%p2113_p5) }
  0x1a   : > { %301 = vst [vmem:[#allocation2 + $0x80] sm:$0xff] (!%p2113_p5), %v300_v17  ;;  %303 = vst [vmem:[#allocation2 + $0x88] sm:$0xff] (!%p2113_p5), %v302_v18  ;;  %v310_v22 = vld [vmem:[%s3955_s2 + $0xa8] sm:$0xff] (!%p2113_p5)  ;;  %v312_v23 = vld [vmem:[%s3955_s2 + $0xb0] sm:$0xff] (!%p2113_p5) }
  0x1b   : > { %305 = vst [vmem:[#allocation2 + $0x90] sm:$0xff] (!%p2113_p5), %v304_v19  ;;  %307 = vst [vmem:[#allocation2 + $0x98] sm:$0xff] (!%p2113_p5), %v306_v20  ;;  %v314_v24 = vld [vmem:[%s3955_s2 + $0xb8] sm:$0xff] (!%p2113_p5)  ;;  %v316_v25 = vld [vmem:[%s3955_s2 + $0xc0] sm:$0xff] (!%p2113_p5) }
  0x1c   : > { %309 = vst [vmem:[#allocation2 + $0xa0] sm:$0xff] %v308_v21  ;;  %311 = vst [vmem:[#allocation2 + $0xa8] sm:$0xff] %v310_v22  ;;  %v318_v26 = vld [vmem:[%s3955_s2 + $0xc8] sm:$0xff]  ;;  %v320_v27 = vld [vmem:[%s3955_s2 + $0xd0] sm:$0xff] }
  0x1d   : > { %313 = vst [vmem:[#allocation2 + $0xb0] sm:$0xff] %v312_v23  ;;  %315 = vst [vmem:[#allocation2 + $0xb8] sm:$0xff] %v314_v24  ;;  %v322_v28 = vld [vmem:[%s3955_s2 + $0xd8] sm:$0xff]  ;;  %v324_v29 = vld [vmem:[%s3955_s2 + $0xe0] sm:$0xff] }
  0x1e   : > { %317 = vst [vmem:[#allocation2 + $0xc0] sm:$0xff] %v316_v25  ;;  %319 = vst [vmem:[#allocation2 + $0xc8] sm:$0xff] %v318_v26  ;;  %v326_v30 = vld [vmem:[%s3955_s2 + $0xe8] sm:$0xff]  ;;  %v328_v31 = vld [vmem:[%s3955_s2 + $0xf0] sm:$0xff] }
  0x1f   : > { %321 = vst [vmem:[#allocation2 + $0xd0] sm:$0xff] %v320_v27  ;;  %323 = vst [vmem:[#allocation2 + $0xd8] sm:$0xff] %v322_v28  ;;  %v330_v32 = vld [vmem:[%s3955_s2 + $0xf8] sm:$0xff]  ;;  %v332_v33 = vld [vmem:[%s3955_s2 + $0x100] sm:$0xff] }
  0x20   : > { %325 = vst [vmem:[#allocation2 + $0xe0] sm:$0xff] %v324_v29  ;;  %327 = vst [vmem:[#allocation2 + $0xe8] sm:$0xff] %v326_v30  ;;  %v334_v34 = vld [vmem:[%s3955_s2 + $0x108] sm:$0xff]  ;;  %v336_v35 = vld [vmem:[%s3955_s2 + $0x110] sm:$0xff] }
  0x21   : > { %329 = vst [vmem:[#allocation2 + $0xf0] sm:$0xff] %v328_v31  ;;  %331 = vst [vmem:[#allocation2 + $0xf8] sm:$0xff] %v330_v32  ;;  %v338_v36 = vld [vmem:[%s3955_s2 + $0x118] sm:$0xff]  ;;  %v340_v37 = vld [vmem:[%s3955_s2 + $0x120] sm:$0xff] }
  0x22   : > { %333 = vst [vmem:[#allocation2 + $0x100] sm:$0xff] %v332_v33  ;;  %335 = vst [vmem:[#allocation2 + $0x108] sm:$0xff] %v334_v34  ;;  %v342_v38 = vld [vmem:[%s3955_s2 + $0x128] sm:$0xff]  ;;  %v344_v39 = vld [vmem:[%s3955_s2 + $0x130] sm:$0xff] }
  0x23   : > { %337 = vst [vmem:[#allocation2 + $0x110] sm:$0xff] %v336_v35  ;;  %339 = vst [vmem:[#allocation2 + $0x118] sm:$0xff] %v338_v36  ;;  %v346_v40 = vld [vmem:[%s3955_s2 + $0x138] sm:$0xff]  ;;  %v348_v41 = vld [vmem:[%s3955_s2 + $0x140] sm:$0xff] }
  0x24   : > { %341 = vst [vmem:[#allocation2 + $0x120] sm:$0xff] %v340_v37  ;;  %343 = vst [vmem:[#allocation2 + $0x128] sm:$0xff] %v342_v38  ;;  %v350_v42 = vld [vmem:[%s3955_s2 + $0x148] sm:$0xff]  ;;  %v352_v43 = vld [vmem:[%s3955_s2 + $0x150] sm:$0xff] }
  0x25   : > { %345 = vst [vmem:[#allocation2 + $0x130] sm:$0xff] %v344_v39  ;;  %347 = vst [vmem:[#allocation2 + $0x138] sm:$0xff] %v346_v40  ;;  %v354_v44 = vld [vmem:[%s3955_s2 + $0x158] sm:$0xff]  ;;  %v356_v45 = vld [vmem:[%s3955_s2 + $0x160] sm:$0xff] }
  0x26   : > { %349 = vst [vmem:[#allocation2 + $0x140] sm:$0xff] %v348_v41  ;;  %351 = vst [vmem:[#allocation2 + $0x148] sm:$0xff] %v350_v42  ;;  %v358_v46 = vld [vmem:[%s3955_s2 + $0x168] sm:$0xff]  ;;  %v360_v47 = vld [vmem:[%s3955_s2 + $0x170] sm:$0xff] }
  0x27   : > { %353 = vst [vmem:[#allocation2 + $0x150] sm:$0xff] %v352_v43  ;;  %355 = vst [vmem:[#allocation2 + $0x158] sm:$0xff] %v354_v44  ;;  %v362_v48 = vld [vmem:[%s3955_s2 + $0x178] sm:$0xff]  ;;  %v364_v49 = vld [vmem:[%s3955_s2 + $0x180] sm:$0xff] }
  0x28   : > { %357 = vst [vmem:[#allocation2 + $0x160] sm:$0xff] %v356_v45  ;;  %359 = vst [vmem:[#allocation2 + $0x168] sm:$0xff] %v358_v46  ;;  %v366_v50 = vld [vmem:[%s3955_s2 + $0x188] sm:$0xff]  ;;  %v368_v51 = vld [vmem:[%s3955_s2 + $0x190] sm:$0xff] }
  0x29   : > { %361 = vst [vmem:[#allocation2 + $0x170] sm:$0xff] %v360_v47  ;;  %363 = vst [vmem:[#allocation2 + $0x178] sm:$0xff] %v362_v48  ;;  %v370_v52 = vld [vmem:[%s3955_s2 + $0x198] sm:$0xff]  ;;  %v372_v53 = vld [vmem:[%s3955_s2 + $0x1a0] sm:$0xff] }
  0x2a   : > { %365 = vst [vmem:[#allocation2 + $0x180] sm:$0xff] %v364_v49  ;;  %367 = vst [vmem:[#allocation2 + $0x188] sm:$0xff] %v366_v50  ;;  %v374_v54 = vld [vmem:[%s3955_s2 + $0x1a8] sm:$0xff]  ;;  %v376_v55 = vld [vmem:[%s3955_s2 + $0x1b0] sm:$0xff] }
  0x2b   : > { %369 = vst [vmem:[#allocation2 + $0x190] sm:$0xff] %v368_v51  ;;  %371 = vst [vmem:[#allocation2 + $0x198] sm:$0xff] %v370_v52  ;;  %v378_v56 = vld [vmem:[%s3955_s2 + $0x1b8] sm:$0xff]  ;;  %v380_v57 = vld [vmem:[%s3955_s2 + $0x1c0] sm:$0xff] }
  0x2c   : > { %373 = vst [vmem:[#allocation2 + $0x1a0] sm:$0xff] %v372_v53  ;;  %375 = vst [vmem:[#allocation2 + $0x1a8] sm:$0xff] %v374_v54  ;;  %v382_v58 = vld [vmem:[%s3955_s2 + $0x1c8] sm:$0xff]  ;;  %v384_v59 = vld [vmem:[%s3955_s2 + $0x1d0] sm:$0xff] }
  0x2d   : > { %377 = vst [vmem:[#allocation2 + $0x1b0] sm:$0xff] %v376_v55  ;;  %379 = vst [vmem:[#allocation2 + $0x1b8] sm:$0xff] %v378_v56  ;;  %v386_v60 = vld [vmem:[%s3955_s2 + $0x1d8] sm:$0xff]  ;;  %v388_v61 = vld [vmem:[%s3955_s2 + $0x1e0] sm:$0xff] }
  0x2e   : > { %381 = vst [vmem:[#allocation2 + $0x1c0] sm:$0xff] %v380_v57  ;;  %383 = vst [vmem:[#allocation2 + $0x1c8] sm:$0xff] %v382_v58  ;;  %v390_v62 = vld [vmem:[%s3955_s2 + $0x1e8] sm:$0xff]  ;;  %v392_v63 = vld [vmem:[%s3955_s2 + $0x1f0] sm:$0xff] }
  0x2f   : > { %385 = vst [vmem:[#allocation2 + $0x1d0] sm:$0xff] %v384_v59  ;;  %387 = vst [vmem:[#allocation2 + $0x1d8] sm:$0xff] %v386_v60  ;;  %v394_v0 = vld [vmem:[%s3955_s2 + $0x1f8] sm:$0xff]  ;;  %v396_v1 = vld [vmem:[%s3955_s2 + $0x200] sm:$0xff] }
  0x30   : > { %389 = vst [vmem:[#allocation2 + $0x1e0] sm:$0xff] %v388_v61  ;;  %391 = vst [vmem:[#allocation2 + $0x1e8] sm:$0xff] %v390_v62  ;;  %v398_v2 = vld [vmem:[%s3955_s2 + $0x208] sm:$0xff]  ;;  %v400_v3 = vld [vmem:[%s3955_s2 + $0x210] sm:$0xff] }
  0x31   : > { %393 = vst [vmem:[#allocation2 + $0x1f0] sm:$0xff] %v392_v63  ;;  %395 = vst [vmem:[#allocation2 + $0x1f8] sm:$0xff] %v394_v0  ;;  %v402_v4 = vld [vmem:[%s3955_s2 + $0x218] sm:$0xff]  ;;  %v404_v5 = vld [vmem:[%s3955_s2 + $0x220] sm:$0xff] }
  0x32   : > { %397 = vst [vmem:[#allocation2 + $0x200] sm:$0xff] %v396_v1  ;;  %399 = vst [vmem:[#allocation2 + $0x208] sm:$0xff] %v398_v2  ;;  %v406_v6 = vld [vmem:[%s3955_s2 + $0x228] sm:$0xff]  ;;  %v408_v7 = vld [vmem:[%s3955_s2 + $0x230] sm:$0xff] }
  0x33   : > { %401 = vst [vmem:[#allocation2 + $0x210] sm:$0xff] %v400_v3  ;;  %403 = vst [vmem:[#allocation2 + $0x218] sm:$0xff] %v402_v4  ;;  %v410_v8 = vld [vmem:[%s3955_s2 + $0x238] sm:$0xff]  ;;  %v412_v9 = vld [vmem:[%s3955_s2 + $0x240] sm:$0xff] }
  0x34   : > { %405 = vst [vmem:[#allocation2 + $0x220] sm:$0xff] %v404_v5  ;;  %407 = vst [vmem:[#allocation2 + $0x228] sm:$0xff] %v406_v6  ;;  %v414_v10 = vld [vmem:[%s3955_s2 + $0x248] sm:$0xff]  ;;  %v416_v11 = vld [vmem:[%s3955_s2 + $0x250] sm:$0xff] }
  0x35   : > { %409 = vst [vmem:[#allocation2 + $0x230] sm:$0xff] %v408_v7  ;;  %411 = vst [vmem:[#allocation2 + $0x238] sm:$0xff] %v410_v8  ;;  %v418_v12 = vld [vmem:[%s3955_s2 + $0x258] sm:$0xff]  ;;  %v420_v13 = vld [vmem:[%s3955_s2 + $0x260] sm:$0xff] }
  0x36   : > { %413 = vst [vmem:[#allocation2 + $0x240] sm:$0xff] %v412_v9  ;;  %415 = vst [vmem:[#allocation2 + $0x248] sm:$0xff] %v414_v10  ;;  %v422_v14 = vld [vmem:[%s3955_s2 + $0x268] sm:$0xff]  ;;  %v424_v15 = vld [vmem:[%s3955_s2 + $0x270] sm:$0xff] }
  0x37   : > { %417 = vst [vmem:[#allocation2 + $0x250] sm:$0xff] %v416_v11  ;;  %419 = vst [vmem:[#allocation2 + $0x258] sm:$0xff] %v418_v12  ;;  %v426_v16 = vld [vmem:[%s3955_s2 + $0x278] sm:$0xff]  ;;  %v428_v17 = vld [vmem:[%s3955_s2 + $0x280] sm:$0xff] }
  0x38   : > { %421 = vst [vmem:[#allocation2 + $0x260] sm:$0xff] %v420_v13  ;;  %423 = vst [vmem:[#allocation2 + $0x268] sm:$0xff] %v422_v14  ;;  %v430_v18 = vld [vmem:[%s3955_s2 + $0x288] sm:$0xff]  ;;  %v432_v19 = vld [vmem:[%s3955_s2 + $0x290] sm:$0xff] }
  0x39   : > { %425 = vst [vmem:[#allocation2 + $0x270] sm:$0xff] %v424_v15  ;;  %427 = vst [vmem:[#allocation2 + $0x278] sm:$0xff] %v426_v16  ;;  %v434_v20 = vld [vmem:[%s3955_s2 + $0x298] sm:$0xff]  ;;  %v436_v21 = vld [vmem:[%s3955_s2 + $0x2a0] sm:$0xff] }
  0x3a   : > { %429 = vst [vmem:[#allocation2 + $0x280] sm:$0xff] %v428_v17  ;;  %431 = vst [vmem:[#allocation2 + $0x288] sm:$0xff] %v430_v18  ;;  %v438_v22 = vld [vmem:[%s3955_s2 + $0x2a8] sm:$0xff]  ;;  %v440_v23 = vld [vmem:[%s3955_s2 + $0x2b0] sm:$0xff] }
  0x3b   : > { %433 = vst [vmem:[#allocation2 + $0x290] sm:$0xff] %v432_v19  ;;  %435 = vst [vmem:[#allocation2 + $0x298] sm:$0xff] %v434_v20  ;;  %v442_v24 = vld [vmem:[%s3955_s2 + $0x2b8] sm:$0xff]  ;;  %v444_v25 = vld [vmem:[%s3955_s2 + $0x2c0] sm:$0xff] }
  0x3c   : > { %437 = vst [vmem:[#allocation2 + $0x2a0] sm:$0xff] %v436_v21  ;;  %439 = vst [vmem:[#allocation2 + $0x2a8] sm:$0xff] %v438_v22  ;;  %v446_v26 = vld [vmem:[%s3955_s2 + $0x2c8] sm:$0xff]  ;;  %v448_v27 = vld [vmem:[%s3955_s2 + $0x2d0] sm:$0xff] }
  0x3d   : > { %441 = vst [vmem:[#allocation2 + $0x2b0] sm:$0xff] %v440_v23  ;;  %443 = vst [vmem:[#allocation2 + $0x2b8] sm:$0xff] %v442_v24  ;;  %v450_v28 = vld [vmem:[%s3955_s2 + $0x2d8] sm:$0xff]  ;;  %v452_v29 = vld [vmem:[%s3955_s2 + $0x2e0] sm:$0xff] }
  0x3e   : > { %445 = vst [vmem:[#allocation2 + $0x2c0] sm:$0xff] %v444_v25  ;;  %447 = vst [vmem:[#allocation2 + $0x2c8] sm:$0xff] %v446_v26  ;;  %v454_v30 = vld [vmem:[%s3955_s2 + $0x2e8] sm:$0xff]  ;;  %v456_v31 = vld [vmem:[%s3955_s2 + $0x2f0] sm:$0xff] }
  0x3f   : > { %449 = vst [vmem:[#allocation2 + $0x2d0] sm:$0xff] %v448_v27  ;;  %451 = vst [vmem:[#allocation2 + $0x2d8] sm:$0xff] %v450_v28  ;;  %v458_v32 = vld [vmem:[%s3955_s2 + $0x2f8] sm:$0xff] }
  0x40   : > { %453 = vst [vmem:[#allocation2 + $0x2e0] sm:$0xff] %v452_v29  ;;  %455 = vst [vmem:[#allocation2 + $0x2e8] sm:$0xff] %v454_v30 }
  0x41   : > { %457 = vst [vmem:[#allocation2 + $0x2f0] sm:$0xff] %v456_v31  ;;  %459 = vst [vmem:[#allocation2 + $0x2f8] sm:$0xff] %v458_v32 }
  0x42   : > { %467 = vsyncadd [#allocation6], 12288  ;;  %v501_v33 = vld [vmem:[%s3956_s3] sm:$0xff]  ;;  %v503_v34 = vld [vmem:[%s3956_s3 + $0x8] sm:$0xff] }
  0x43   : > { %502 = vst [vmem:[#allocation3] sm:$0xff] %v501_v33  ;;  %504 = vst [vmem:[#allocation3 + $0x8] sm:$0xff] %v503_v34 }
  0x44   : > { %512 = vsyncadd [#allocation6 + $0x1], 256 }
  0x45   : > { %3120 = dma.done.wait [#allocation6], 12288 }
  0x46   : > { %3121 = vsyncadd [#allocation6], 4294955008 }
  0x47   : > { %3122 = dma.done.wait [#allocation6 + $0x1], 256 }
  0x48   : > { %3123 = vsyncadd [#allocation6 + $0x1], 4294967040 }
  0x49 PF: > { %v523_v35 = vld [vmem:[#allocation2 + $0x8] sm:$0xff]  ;;  %v526_v36 = vld [vmem:[#allocation2 + $0x20] sm:$0xff]  ;;  %v525_v39 = vld [vmem:[#allocation2 + $0x18] sm:$0xff]  ;;  %v3961_v42 = vmov 0.0|0.0   ;;  %v3959_v43 = vmov 0.0   ;;  %vm3131_vm0 = vmmov 0  }
  0x4a   : > { %v522_v37 = vld [vmem:[#allocation2] sm:$0xff]  ;;  %v3484_v38 = vpack.c.bf16 %v526_v36, %v523_v35  ;;  %v529_v40 = vld [vmem:[#allocation2 + $0x38] sm:$0xff]  ;;  %2606 = vmatprep.subr.bf16.mxu1 %v3961_v42  ;;  %691 = vmatprep.mubr.f32.mxu0 %v3959_v43  ;;  %v528_v46 = vld [vmem:[#allocation2 + $0x30] sm:$0xff] }
  0x4b   : > { %v532_v41 = vld [vmem:[#allocation2 + $0x50] sm:$0xff]  ;;  %v3488_v44 = vpack.c.bf16 %v525_v39, %v522_v37  ;;  %v531_v47 = vld [vmem:[#allocation2 + $0x48] sm:$0xff]  ;;  %2326 = vmatprep.mubr.msk.f32.mxu1 %vm3131_vm0, %v3959_v43  ;;  %v550_v63 = vld [vmem:[#allocation2 + $0xe0] sm:$0xff] }
  0x4c   : > { %v3490_v45 = vpack.c.bf16 %v532_v41, %v529_v40  ;;  %v535_v48 = vld [vmem:[#allocation2 + $0x68] sm:$0xff]  ;;  %2575 = vmatprep.subr.bf16.mxu0 %v3484_v38  ;;  %v3496_v50 = vpack.c.bf16 %v531_v47, %v528_v46  ;;  %v534_v52 = vld [vmem:[#allocation2 + $0x60] sm:$0xff]  ;;  %v544_v55 = vld [vmem:[#allocation2 + $0xb0] sm:$0xff] }
  0x4d   : > { %2577 = vmatpush1.bf16.msra.mxu0 %v3488_v44  ;;  %v537_v53 = vld [vmem:[#allocation2 + $0x78] sm:$0xff]  ;;  %v524_v60 = vld [vmem:[#allocation2 + $0x10] sm:$0xff]  ;;  %v527_v61 = vld [vmem:[#allocation2 + $0x28] sm:$0xff] }
  0x4e   : > { %v538_v49 = vld [vmem:[#allocation2 + $0x80] sm:$0xff]  ;;  %2579 = vmatprep.subr.bf16.mxu0 %v3490_v45  ;;  %v3502_v56 = vpack.c.bf16 %v537_v53, %v534_v52  ;;  %v547_v62 = vld [vmem:[#allocation2 + $0xc8] sm:$0xff]  ;;  %v3507_v0 = vpack.c.bf16 %v527_v61, %v524_v60  ;;  %v533_v2 = vld [vmem:[#allocation2 + $0x58] sm:$0xff] }
  0x4f   : > { %v3499_v51 = vpack.c.bf16 %v538_v49, %v535_v48  ;;  %v541_v54 = vld [vmem:[#allocation2 + $0x98] sm:$0xff]  ;;  %v540_v57 = vld [vmem:[#allocation2 + $0x90] sm:$0xff]  ;;  %v530_v1 = vld [vmem:[#allocation2 + $0x40] sm:$0xff]  ;;  %v3516_v5 = vpack.c.bf16 %v550_v63, %v547_v62 }
  0x50   : > { %v3505_v58 = vpack.c.bf16 %v544_v55, %v541_v54  ;;  %v543_v59 = vld [vmem:[#allocation2 + $0xa8] sm:$0xff]  ;;  %2608 = vmatpush3.bf16.msra.mxu1 %v3507_v0  ;;  %v3513_v4 = vpack.c.bf16 %v533_v2, %v530_v1  ;;  %v546_v6 = vld [vmem:[#allocation2 + $0xc0] sm:$0xff]  ;;  %v549_v7 = vld [vmem:[#allocation2 + $0xd8] sm:$0xff] }
  0x51   : > { %2581 = vmatpush1.bf16.msra.mxu0 %v3496_v50  ;;  %v3510_v3 = vpack.c.bf16 %v543_v59, %v540_v57  ;;  %2609 = vmatprep.subr.bf16.mxu1 %v3961_v42  ;;  %v536_v8 = vld [vmem:[#allocation2 + $0x70] sm:$0xff]  ;;  %v553_v9 = vld [vmem:[#allocation2 + $0xf8] sm:$0xff]  ;;  %v539_v11 = vld [vmem:[#allocation2 + $0x88] sm:$0xff]  ;;  %v3520_v12 = vpack.c.bf16 %v549_v7, %v546_v6 }
  0x52   : > { %2583 = vmatprep.subr.bf16.mxu0 %v3499_v51  ;;  %v556_v10 = vld [vmem:[#allocation2 + $0x110] sm:$0xff]  ;;  %v3523_v14 = vpack.c.bf16 %v539_v11, %v536_v8  ;;  %v555_v16 = vld [vmem:[#allocation2 + $0x108] sm:$0xff]  ;;  %v542_v17 = vld [vmem:[#allocation2 + $0xa0] sm:$0xff] }
  0x53   : > { %v552_v13 = vld [vmem:[#allocation2 + $0xf0] sm:$0xff]  ;;  %v3526_v15 = vpack.c.bf16 %v556_v10, %v553_v9  ;;  %v545_v18 = vld [vmem:[#allocation2 + $0xb8] sm:$0xff]  ;;  %v559_v19 = vld [vmem:[#allocation2 + $0x128] sm:$0xff] }
  0x54   : > { %2611 = vmatpush3.bf16.msra.mxu1 %v3513_v4  ;;  %v562_v20 = vld [vmem:[#allocation2 + $0x140] sm:$0xff]  ;;  %v3530_v21 = vpack.c.bf16 %v555_v16, %v552_v13  ;;  %v3533_v23 = vpack.c.bf16 %v545_v18, %v542_v17  ;;  %v561_v25 = vld [vmem:[#allocation2 + $0x138] sm:$0xff]  ;;  %v548_v26 = vld [vmem:[#allocation2 + $0xd0] sm:$0xff] }
  0x55   : > { %2585 = vmatpush1.bf16.msra.mxu0 %v3502_v56  ;;  %2612 = vmatprep.subr.bf16.mxu1 %v3961_v42  ;;  %v558_v22 = vld [vmem:[#allocation2 + $0x120] sm:$0xff]  ;;  %v3536_v24 = vpack.c.bf16 %v562_v20, %v559_v19  ;;  %v551_v27 = vld [vmem:[#allocation2 + $0xe8] sm:$0xff]  ;;  %v565_v28 = vld [vmem:[#allocation2 + $0x158] sm:$0xff] }
  0x56   : > { %2587 = vmatprep.subr.bf16.mxu0 %v3505_v58  ;;  %v568_v29 = vld [vmem:[#allocation2 + $0x170] sm:$0xff]  ;;  %v3540_v30 = vpack.c.bf16 %v561_v25, %v558_v22  ;;  %v3543_v32 = vpack.c.bf16 %v551_v27, %v548_v26  ;;  %v567_v34 = vld [vmem:[#allocation2 + $0x168] sm:$0xff]  ;;  %v554_v35 = vld [vmem:[#allocation2 + $0x100] sm:$0xff] }
  0x57   : > { %3978 = vst [vmem:[#allocation11_spill] sm:$0xff] %v3536_v24  ;;  %v564_v31 = vld [vmem:[#allocation2 + $0x150] sm:$0xff]  ;;  %v3546_v33 = vpack.c.bf16 %v568_v29, %v565_v28  ;;  %v557_v36 = vld [vmem:[#allocation2 + $0x118] sm:$0xff]  ;;  %v572_v37 = vld [vmem:[#allocation2 + $0x188] sm:$0xff] }
  0x58   : > { %2614 = vmatpush3.bf16.msra.mxu1 %v3523_v14  ;;  %3979 = vst [vmem:[#allocation12_spill] sm:$0xff] %v3540_v30  ;;  %v575_v39 = vld [vmem:[#allocation2 + $0x1a0] sm:$0xff]  ;;  %v3550_v40 = vpack.c.bf16 %v567_v34, %v564_v31  ;;  %v3553_v46 = vpack.c.bf16 %v557_v36, %v554_v35  ;;  %v574_v48 = vld [vmem:[#allocation2 + $0x198] sm:$0xff]  ;;  %v560_v49 = vld [vmem:[#allocation2 + $0x130] sm:$0xff] }
  0x59   : > { %2589 = vmatpush1.bf16.msra.mxu0 %v3510_v3  ;;  %2615 = vmatprep.subr.bf16.mxu1 %v3961_v42  ;;  %3980 = vst [vmem:[#allocation13_spill] sm:$0xff] %v3546_v33  ;;  %v571_v41 = vld [vmem:[#allocation2 + $0x180] sm:$0xff]  ;;  %v3556_v47 = vpack.c.bf16 %v575_v39, %v572_v37  ;;  %v563_v52 = vld [vmem:[#allocation2 + $0x148] sm:$0xff]  ;;  %v578_v53 = vld [vmem:[#allocation2 + $0x1b8] sm:$0xff] }
  0x5a   : > { %2591 = vmatprep.subr.bf16.mxu0 %v3516_v5  ;;  %3981 = vst [vmem:[#allocation14_spill] sm:$0xff] %v3550_v40  ;;  %3982 = vst [vmem:[#allocation15_spill] sm:$0xff] %v3553_v46  ;;  %v581_v54 = vld [vmem:[#allocation2 + $0x1d0] sm:$0xff]  ;;  %v3562_v57 = vpack.c.bf16 %v574_v48, %v571_v41  ;;  %v3565_v60 = vpack.c.bf16 %v563_v52, %v560_v49  ;;  %v580_v62 = vld [vmem:[#allocation2 + $0x1c8] sm:$0xff] }
  0x5b   : > { %3983 = vst [vmem:[#allocation16_spill] sm:$0xff] %v3556_v47  ;;  %v3560_v55 = vld [vmem:[#allocation4] sm:$0xff]  ;;  %v3568_v61 = vpack.c.bf16 %v581_v54, %v578_v53  ;;  %v566_v63 = vld [vmem:[#allocation2 + $0x160] sm:$0xff]  ;;  %v569_v1 = vld [vmem:[#allocation2 + $0x178] sm:$0xff] }
  0x5c   : > { %2617 = vmatpush3.bf16.msra.mxu1 %v3533_v23  ;;  %v577_v59 = vld [vmem:[#allocation2 + $0x1b0] sm:$0xff]  ;;  %3984 = vst [vmem:[#allocation17_spill] sm:$0xff] %v3565_v60  ;;  %v584_v2 = vld [vmem:[#allocation2 + $0x1e8] sm:$0xff]  ;;  %v587_v6 = vld [vmem:[#allocation2 + $0x200] sm:$0xff]  ;;  %v3576_v9 = vpack.c.bf16 %v569_v1, %v566_v63 }
  0x5d   : > { %2593 = vmatpush1.bf16.msra.mxu0 %v3520_v12  ;;  %2618 = vmatprep.subr.bf16.mxu1 %v3961_v42  ;;  %v3573_v7 = vpack.c.bf16 %v580_v62, %v577_v59  ;;  %v583_v8 = vld [vmem:[#allocation2 + $0x1e0] sm:$0xff]  ;;  %v3579_v10 = vpack.c.bf16 %v587_v6, %v584_v2  ;;  %v586_v11 = vld [vmem:[#allocation2 + $0x1f8] sm:$0xff]  ;;  %v573_v13 = vld [vmem:[#allocation2 + $0x190] sm:$0xff] }
  0x5e   : > { %2595 = vmatprep.subr.bf16.mxu0 %v3526_v15  ;;  %3985 = vst [vmem:[#allocation18_spill] sm:$0xff] %v3576_v9  ;;  %v576_v16 = vld [vmem:[#allocation2 + $0x1a8] sm:$0xff]  ;;  %v590_v17 = vld [vmem:[#allocation2 + $0x218] sm:$0xff]  ;;  %v593_v18 = vld [vmem:[#allocation2 + $0x230] sm:$0xff]  ;;  %v3584_v19 = vpack.c.bf16 %v586_v11, %v583_v8 }
  0x5f   : > { %v589_v20 = vld [vmem:[#allocation2 + $0x210] sm:$0xff]  ;;  %v3587_v22 = vpack.c.bf16 %v576_v16, %v573_v13  ;;  %v3590_v25 = vpack.c.bf16 %v593_v18, %v590_v17  ;;  %v592_v26 = vld [vmem:[#allocation2 + $0x228] sm:$0xff]  ;;  %v579_v27 = vld [vmem:[#allocation2 + $0x1c0] sm:$0xff] }
  0x60   : > { %2620 = vmatpush3.bf16.msra.mxu1 %v3543_v32  ;;  %v582_v28 = vld [vmem:[#allocation2 + $0x1d8] sm:$0xff]  ;;  %v596_v29 = vld [vmem:[#allocation2 + $0x248] sm:$0xff]  ;;  %v599_v31 = vld [vmem:[#allocation2 + $0x260] sm:$0xff]  ;;  %v3595_v34 = vpack.c.bf16 %v592_v26, %v589_v20 }
  0x61   : > { %2597 = vmatpush1.bf16.msra.mxu0 %v3530_v21  ;;  %2621 = vmatprep.subr.bf16.mxu1 %v3961_v42  ;;  %v595_v35 = vld [vmem:[#allocation2 + $0x240] sm:$0xff]  ;;  %v3598_v36 = vpack.c.bf16 %v582_v28, %v579_v27  ;;  %v3601_v37 = vpack.c.bf16 %v599_v31, %v596_v29  ;;  %v598_v39 = vld [vmem:[#allocation2 + $0x258] sm:$0xff]  ;;  %v585_v41 = vld [vmem:[#allocation2 + $0x1f0] sm:$0xff] }
  0x62   : > { %2599 = vmatprep.subr.bf16.mxu0 %v3536_v24  ;;  %v588_v48 = vld [vmem:[#allocation2 + $0x208] sm:$0xff]  ;;  %v602_v49 = vld [vmem:[#allocation2 + $0x278] sm:$0xff]  ;;  %v605_v52 = vld [vmem:[#allocation2 + $0x290] sm:$0xff]  ;;  %v3607_v53 = vpack.c.bf16 %v598_v39, %v595_v35 }
  0x63   : > { %v601_v54 = vld [vmem:[#allocation2 + $0x270] sm:$0xff]  ;;  %v3610_v59 = vpack.c.bf16 %v588_v48, %v585_v41  ;;  %v3613_v62 = vpack.c.bf16 %v605_v52, %v602_v49  ;;  %v604_v63 = vld [vmem:[#allocation2 + $0x288] sm:$0xff]  ;;  %v591_v1 = vld [vmem:[#allocation2 + $0x220] sm:$0xff] }
  0x64   : > { %2623 = vmatpush3.bf16.msra.mxu1 %v3553_v46  ;;  %v594_v2 = vld [vmem:[#allocation2 + $0x238] sm:$0xff]  ;;  %v608_v6 = vld [vmem:[#allocation2 + $0x2a8] sm:$0xff]  ;;  %v611_v8 = vld [vmem:[#allocation2 + $0x2c0] sm:$0xff]  ;;  %v3617_v11 = vpack.c.bf16 %v604_v63, %v601_v54 }
  0x65   : > { %2601 = vmatpush1.bf16.msra.mxu0 %v3540_v30  ;;  %2624 = vmatprep.subr.bf16.mxu1 %v3961_v42  ;;  %v607_v13 = vld [vmem:[#allocation2 + $0x2a0] sm:$0xff]  ;;  %v3620_v16 = vpack.c.bf16 %v594_v2, %v591_v1  ;;  %v3623_v17 = vpack.c.bf16 %v611_v8, %v608_v6  ;;  %v610_v18 = vld [vmem:[#allocation2 + $0x2b8] sm:$0xff]  ;;  %v597_v20 = vld [vmem:[#allocation2 + $0x250] sm:$0xff] }
  0x66   : > { %2603 = vmatprep.subr.bf16.mxu0 %v3546_v33  ;;  %v600_v26 = vld [vmem:[#allocation2 + $0x268] sm:$0xff]  ;;  %v614_v27 = vld [vmem:[#allocation2 + $0x2d8] sm:$0xff]  ;;  %v617_v28 = vld [vmem:[#allocation2 + $0x2f0] sm:$0xff]  ;;  %v3627_v29 = vpack.c.bf16 %v610_v18, %v607_v13 }
  0x67   : > { %v613_v31 = vld [vmem:[#allocation2 + $0x2d0] sm:$0xff]  ;;  %v3630_v35 = vpack.c.bf16 %v600_v26, %v597_v20  ;;  %v3633_v39 = vpack.c.bf16 %v617_v28, %v614_v27  ;;  %v616_v41 = vld [vmem:[#allocation2 + $0x2e8] sm:$0xff]  ;;  %v603_v48 = vld [vmem:[#allocation2 + $0x280] sm:$0xff] }
  0x68   : > { %2626 = vmatpush3.bf16.msra.mxu1 %v3565_v60  ;;  %v606_v49 = vld [vmem:[#allocation2 + $0x298] sm:$0xff]  ;;  %v3637_v52 = vpack.c.bf16 %v616_v41, %v613_v31  ;;  %v609_v63 = vld [vmem:[#allocation2 + $0x2b0] sm:$0xff]  ;;  %v612_v1 = vld [vmem:[#allocation2 + $0x2c8] sm:$0xff] }
  0x69   : > { %2605 = vmatpush1.bf16.msra.mxu0 %v3550_v40  ;;  %2627 = vmatprep.subr.bf16.mxu1 %v3961_v42  ;;  %v3640_v54 = vpack.c.bf16 %v606_v49, %v603_v48  ;;  %v3645_v2 = vld [vmem:[#allocation5] sm:$0xff]  ;;  %v3648_v6 = vpack.c.bf16 %v612_v1, %v609_v63  ;;  %v615_v8 = vld [vmem:[#allocation2 + $0x2e0] sm:$0xff]  ;;  %v625_v41 = vld [vmem:[%s3178_s6 + $0x8] sm:$0xff] }
  0x6a   : > { %2631 = vmatprep.subr.bf16.mxu0 %v3556_v47  ;;  %v618_v13 = vld [vmem:[#allocation2 + $0x2f8] sm:$0xff]  ;;  %v624_v20 = vld [vmem:[%s3178_s6] sm:$0xff] }
  0x6b   : > { %v3654_v18 = vpack.c.bf16 %v618_v13, %v615_v8 }
  0x6c   : > { %692 = vmatmul.mubr.f32.vlgmr.msra.gmra.mrb[0].mxu0 %v3560_v55  ;;  %2629 = vmatpush3.bf16.msra.mxu1 %v3576_v9 }
  0x6d   : > { %2633 = vmatpush1.bf16.msra.mxu0 %v3562_v57  ;;  %858 = vmatprep.mubr.f32.mxu0 %v3959_v43 }
  0x6e   : > { %2635 = vmatprep.subr.bf16.mxu0 %v3568_v61  ;;  %2662 = vmatprep.subr.bf16.mxu1 %v3961_v42 }
  0x6f   : > { %2327 = vmatmul.mubr.f32.vlgmr.msra.gmra.mrb[0].mxu1 %v3560_v55 }
  0x70   : > { %2664 = vmatpush3.bf16.msra.mxu1 %v3587_v22  ;;  %2361 = vmatprep.mubr.msk.f32.mxu1 %vm3131_vm0, %v3959_v43 }
  0x71   : > { %2637 = vmatpush1.bf16.msra.mxu0 %v3573_v7  ;;  %2665 = vmatprep.subr.bf16.mxu1 %v3961_v42 }
  0x72   : > { %2639 = vmatprep.subr.bf16.mxu0 %v3579_v10 }
  0x74   : > { %2667 = vmatpush3.bf16.msra.mxu1 %v3598_v36 }
  0x75   : > { %2641 = vmatpush1.bf16.msra.mxu0 %v3584_v19  ;;  %2668 = vmatprep.subr.bf16.mxu1 %v3961_v42 }
  0x76   : > { %2643 = vmatprep.subr.bf16.mxu0 %v3590_v25 }
  0x78   : > { %2670 = vmatpush3.bf16.msra.mxu1 %v3610_v59 }
  0x79   : > { %2645 = vmatpush1.bf16.msra.mxu0 %v3595_v34  ;;  %2671 = vmatprep.subr.bf16.mxu1 %v3961_v42 }
  0x7a   : > { %2647 = vmatprep.subr.bf16.mxu0 %v3601_v37 }
  0x7c   : > { %2673 = vmatpush3.bf16.msra.mxu1 %v3620_v16 }
  0x7d   : > { %2649 = vmatpush1.bf16.msra.mxu0 %v3607_v53  ;;  %2674 = vmatprep.subr.bf16.mxu1 %v3961_v42 }
  0x7e   : > { %2651 = vmatprep.subr.bf16.mxu0 %v3613_v62 }
  0x80   : > { %2676 = vmatpush3.bf16.msra.mxu1 %v3630_v35 }
  0x81   : > { %2653 = vmatpush1.bf16.msra.mxu0 %v3617_v11  ;;  %2677 = vmatprep.subr.bf16.mxu1 %v3961_v42 }
  0x82   : > { %2655 = vmatprep.subr.bf16.mxu0 %v3623_v17 }
  0x84   : > { %2679 = vmatpush3.bf16.msra.mxu1 %v3640_v54 }
  0x85   : > { %2657 = vmatpush1.bf16.msra.mxu0 %v3627_v29  ;;  %2680 = vmatprep.subr.bf16.mxu1 %v3961_v42 }
  0x86   : > { %2659 = vmatprep.subr.bf16.mxu0 %v3633_v39 }
  0x88   : > { %2682 = vmatpush3.bf16.msra.mxu1 %v3648_v6 }
  0x89   : > { %2661 = vmatpush1.bf16.msra.mxu0 %v3637_v52  ;;  %2683 = vmatprep.subr.bf16.mxu1 %v3961_v42 }
  0x8a   : > { %2687 = vmatprep.subr.bf16.mxu0 %v3484_v38 }
  0x8c   : > { %859 = vmatmul.mubr.f32.vlgmr.msra.gmra.mrb[2].mxu0 %v3645_v2  ;;  %2685 = vmatpush3.bf16.msra.mxu1 %v3654_v18 }
  0x8d   : > { %2689 = vmatpush1.bf16.msra.mxu0 %v3488_v44  ;;  %1026 = vmatprep.mubr.f32.mxu0 %v3959_v43 }
  0x8e   : > { %2691 = vmatprep.subr.bf16.mxu0 %v3490_v45  ;;  %2718 = vmatprep.subr.bf16.mxu1 %v3961_v42 }
  0x8f   : > { %2362 = vmatmul.mubr.f32.vlgmr.msra.gmra.mrb[2].mxu1 %v3645_v2 }
  0x90   : > { %2720 = vmatpush3.bf16.msra.mxu1 %v3507_v0  ;;  %2396 = vmatprep.mubr.msk.f32.mxu1 %vm3131_vm0, %v3959_v43  ;;  %v3697_v43 = vld [vmem:[#allocation3] sm:$0xff] }
  0x91   : > { %2693 = vmatpush1.bf16.msra.mxu0 %v3496_v50  ;;  %2721 = vmatprep.subr.bf16.mxu1 %v3961_v42  ;;  %3986 = vst [vmem:[#allocation19_spill] sm:$0xff] %v3697_v43 }
  0x92   : > { %2695 = vmatprep.subr.bf16.mxu0 %v3499_v51 }
  0x94   : > { %2723 = vmatpush3.bf16.msra.mxu1 %v3513_v4 }
  0x95   : > { %2697 = vmatpush1.bf16.msra.mxu0 %v3502_v56  ;;  %2724 = vmatprep.subr.bf16.mxu1 %v3961_v42 }
  0x96   : > { %2699 = vmatprep.subr.bf16.mxu0 %v3505_v58 }
  0x98   : > { %2726 = vmatpush3.bf16.msra.mxu1 %v3523_v14 }
  0x99   : > { %2701 = vmatpush1.bf16.msra.mxu0 %v3510_v3  ;;  %2727 = vmatprep.subr.bf16.mxu1 %v3961_v42 }
  0x9a   : > { %2703 = vmatprep.subr.bf16.mxu0 %v3516_v5 }
  0x9c   : > { %2729 = vmatpush3.bf16.msra.mxu1 %v3533_v23 }
  0x9d   : > { %2705 = vmatpush1.bf16.msra.mxu0 %v3520_v12  ;;  %2730 = vmatprep.subr.bf16.mxu1 %v3961_v42 }
  0x9e   : > { %2707 = vmatprep.subr.bf16.mxu0 %v3526_v15 }
  0xa0   : > { %2732 = vmatpush3.bf16.msra.mxu1 %v3543_v32 }
  0xa1   : > { %2709 = vmatpush1.bf16.msra.mxu0 %v3530_v21  ;;  %2733 = vmatprep.subr.bf16.mxu1 %v3961_v42 }
  0xa2   : > { %2711 = vmatprep.subr.bf16.mxu0 %v3536_v24 }
  0xa4   : > { %2735 = vmatpush3.bf16.msra.mxu1 %v3553_v46 }
  0xa5   : > { %2713 = vmatpush1.bf16.msra.mxu0 %v3540_v30  ;;  %2736 = vmatprep.subr.bf16.mxu1 %v3961_v42 }
  0xa6   : > { %2715 = vmatprep.subr.bf16.mxu0 %v3546_v33 }
  0xa8   : > { %2738 = vmatpush3.bf16.msra.mxu1 %v3565_v60 }
  0xa9   : > { %2717 = vmatpush1.bf16.msra.mxu0 %v3550_v40  ;;  %2739 = vmatprep.subr.bf16.mxu1 %v3961_v42 }
  0xaa   : > { %2743 = vmatprep.subr.bf16.mxu0 %v3556_v47  ;;  %v626_v47 = vld [vmem:[%s3178_s6 + $0x10] sm:$0xff] }
  0xac   : > { %2741 = vmatpush3.bf16.msra.mxu1 %v3576_v9 }
  0xad   : > { %2774 = vmatprep.subr.bf16.mxu1 %v3961_v42 }
 0x13f   : > { %v693_v26 = vpop.f32.mrb[0].mxu0 }
 0x140   : > { %v768_v27 = vadd.f32 %v693_v26, %v624_v20  ;;  %v695_v28 = vpop.f32.mrb[1].mxu0 }
 0x141   : > { %v775_v49 = vadd.f32 %v695_v28, %v625_v41 }
 0x142   : > { %v2114_v31 = vmul.f32 -1.442695, %v768_v27  ;;  %v764_v48 = vpop.f32.mrb[0].mxu1 }
 0x143   : > { %v2328_v63 = vpop.f32.mrb[1].mxu1  ;;  %v2115_v1 = vmul.f32 -1.442695, %v775_v49  ;;  %v782_v42 = vadd.f32 %v764_v48, %v3697_v43 }
 0x144   : > { %3036 = vpow2.f32 %v2114_v31  ;;  %v2116_v31 = vld [vmem:[%s3183_s10 + $0x48] sm:$0xff]  ;;  %v2117_v63 = vld [vmem:[%s3183_s10 + $0x50] sm:$0xff] }
 0x145   : > { %3038 = vpow2.f32 %v2115_v1 }
 0x14e   : > { %v3037_v8 = vpop.eup %3036 }
 0x14f   : > { %v772_v13 = vadd.f32 1.0, %v3037_v8  ;;  %v3039_v20 = vpop.eup %3038 }
 0x150   : > { %v779_v9 = vadd.f32 1.0, %v3039_v20 }
 0x151   : > { %3040 = vrcp.f32 %v772_v13 }
 0x15b   : > { %v3041_v26 = vpop.eup %3040 }
 0x15c   : > { %v783_v27 = vmul.f32 %v3041_v26, %v782_v42 }
 0x15e   : > { %v784_v40 = vadd.f32 %v783_v27, %v626_v47 }
 0x15f   : > { %v860_v33 = vpop.f32.mrb[2].mxu0 }
 0x160   : > { %3042 = vtanh.f32 %v784_v40  ;;  %v935_v28 = vadd.f32 %v2116_v31, %v860_v33  ;;  %v862_v41 = vpop.f32.mrb[3].mxu0  ;;  %v3988_v33 = vmov 0.0   ;;  %v3717_v40 = vld [vmem:[#allocation3 + $0x8] sm:$0xff]  ;;  %v2118_v31 = vld [vmem:[%s3183_s10 + $0x58] sm:$0xff] }
 0x161   : > { %3044 = vrcp.f32 %v779_v9  ;;  %v942_v8 = vadd.f32 %v2117_v63, %v862_v41 }
 0x162   : > { %v2119_v49 = vmul.f32 -1.442695, %v935_v28  ;;  %v931_v1 = vpop.f32.mrb[2].mxu1 }
 0x163   : > { %v2363_v13 = vpop.f32.mrb[3].mxu1  ;;  %v2120_v42 = vmul.f32 -1.442695, %v942_v8 }
 0x164   : > { %3046 = vpow2.f32 %v2119_v49 }
 0x165   : > { %3048 = vpow2.f32 %v2120_v42  ;;  %v3990_v42 = vld [vmem:[#allocation13_spill] sm:$0xff] }
 0x16a   : > { %v3043_v48 = vpop.eup %3042 }
 0x16b   : > { %v786_v43 = vsub.f32 %v3560_v55, %v3043_v48  ;;  %v3045_v60 = vpop.eup %3044  ;;  %v949_v55 = vadd.f32 %v931_v1, %v3717_v40 }
 0x16d   : > { %v787_v26 = vmul.f32 %v3045_v60, %v786_v43  ;;  %v3987_v43 = vmov 0.0|0.0  }
 0x16e   : > { %v3047_v20 = vpop.eup %3046 }
 0x16f   : > { %v939_v47 = vadd.f32 1.0, %v3047_v20  ;;  %v3704_v27 = vadd.f32 %v3043_v48, %v787_v26  ;;  %v3049_v60 = vpop.eup %3048  ;;  %v3991_v26 = vld [vmem:[#allocation14_spill] sm:$0xff] }
 0x170   : > { %v946_v41 = vadd.f32 1.0, %v3049_v60  ;;  %v3992_v20 = vld [vmem:[#allocation18_spill] sm:$0xff] }
 0x171   : > { %3050 = vrcp.f32 %v939_v47  ;;  %789 = vst [vmem:[%s3173_s28] sm:$0xff] %v3704_v27  ;;  %1027 = vmatmul.mubr.f32.vlgmr.msra.gmra.mrb[4].mxu0 %v3704_v27  ;;  %2397 = vmatmul.mubr.f32.vlgmr.msra.gmra.mrb[4].mxu1 %v3704_v27  ;;  %v3993_v47 = vld [vmem:[#allocation16_spill] sm:$0xff] }
 0x172   : > { %2745 = vmatpush1.bf16.msra.mxu0 %v3562_v57  ;;  %2776 = vmatpush3.bf16.msra.mxu1 %v3587_v22 }
 0x173   : > { %2747 = vmatprep.subr.bf16.mxu0 %v3568_v61  ;;  %2777 = vmatprep.subr.bf16.mxu1 %v3987_v43 }
 0x174   : > { %1194 = vmatprep.mubr.f32.mxu0 %v3988_v33  ;;  %2431 = vmatprep.mubr.msk.f32.mxu1 %vm3131_vm0, %v3988_v33 }
 0x176   : > { %2749 = vmatpush1.bf16.msra.mxu0 %v3573_v7  ;;  %2779 = vmatpush3.bf16.msra.mxu1 %v3598_v36 }
 0x177   : > { %2751 = vmatprep.subr.bf16.mxu0 %v3579_v10  ;;  %2780 = vmatprep.subr.bf16.mxu1 %v3987_v43 }
 0x17a   : > { %2753 = vmatpush1.bf16.msra.mxu0 %v3584_v19  ;;  %2782 = vmatpush3.bf16.msra.mxu1 %v3610_v59 }
 0x17b   : > { %v3051_v9 = vpop.eup %3050  ;;  %2755 = vmatprep.subr.bf16.mxu0 %v3590_v25  ;;  %2783 = vmatprep.subr.bf16.mxu1 %v3987_v43 }
 0x17c   : > { %v950_v28 = vmul.f32 %v3051_v9, %v949_v55  ;;  %v2122_v55 = vld [vmem:[%s3178_s6 + $0x18] sm:$0xff] }
 0x17e   : > { %v951_v49 = vadd.f32 %v2118_v31, %v950_v28  ;;  %2757 = vmatpush1.bf16.msra.mxu0 %v3595_v34  ;;  %2785 = vmatpush3.bf16.msra.mxu1 %v3620_v16 }
 0x17f   : > { %2759 = vmatprep.subr.bf16.mxu0 %v3601_v37  ;;  %2786 = vmatprep.subr.bf16.mxu1 %v3987_v43 }
 0x180   : > { %3052 = vtanh.f32 %v951_v49 }
 0x181   : > { %3054 = vrcp.f32 %v946_v41 }
 0x182   : > { %2761 = vmatpush1.bf16.msra.mxu0 %v3607_v53  ;;  %2788 = vmatpush3.bf16.msra.mxu1 %v3630_v35 }
 0x183   : > { %2763 = vmatprep.subr.bf16.mxu0 %v3613_v62  ;;  %2789 = vmatprep.subr.bf16.mxu1 %v3987_v43 }
 0x186   : > { %2765 = vmatpush1.bf16.msra.mxu0 %v3617_v11  ;;  %2791 = vmatpush3.bf16.msra.mxu1 %v3640_v54 }
 0x187   : > { %2767 = vmatprep.subr.bf16.mxu0 %v3623_v17  ;;  %2792 = vmatprep.subr.bf16.mxu1 %v3987_v43 }
 0x18a   : > { %v3053_v63 = vpop.eup %3052  ;;  %2769 = vmatpush1.bf16.msra.mxu0 %v3627_v29  ;;  %2794 = vmatpush3.bf16.msra.mxu1 %v3648_v6 }
 0x18b   : > { %2771 = vmatprep.subr.bf16.mxu0 %v3633_v39  ;;  %2795 = vmatprep.subr.bf16.mxu1 %v3987_v43  ;;  %v953_v1 = vsub.f32 %v3645_v2, %v3053_v63  ;;  %v3055_v8 = vpop.eup %3054  ;;  %v3989_v2 = vld [vmem:[#allocation17_spill] sm:$0xff] }
 0x18d   : > { %v954_v13 = vmul.f32 %v3055_v8, %v953_v1 }
 0x18e   : > { %2773 = vmatpush1.bf16.msra.mxu0 %v3637_v52  ;;  %2797 = vmatpush3.bf16.msra.mxu1 %v3654_v18 }
 0x18f   : > { %v3748_v48 = vadd.f32 %v3053_v63, %v954_v13  ;;  %2799 = vmatprep.subr.bf16.mxu0 %v3484_v38  ;;  %2830 = vmatprep.subr.bf16.mxu1 %v3987_v43  ;;  %v2123_v63 = vld [vmem:[%s3178_s6 + $0x20] sm:$0xff] }
 0x191   : > { %2121 = vst [vmem:[%s3188_s13 + $0x18] sm:$0xff] %v3748_v48  ;;  %1195 = vmatmul.mubr.f32.vlgmr.msra.gmra.mrb[6].mxu0 %v3748_v48  ;;  %2432 = vmatmul.mubr.f32.vlgmr.msra.gmra.mrb[6].mxu1 %v3748_v48 }
 0x192   : > { %2801 = vmatpush1.bf16.msra.mxu0 %v3488_v44  ;;  %2832 = vmatpush3.bf16.msra.mxu1 %v3507_v0 }
 0x193   : > { %2803 = vmatprep.subr.bf16.mxu0 %v3490_v45  ;;  %2833 = vmatprep.subr.bf16.mxu1 %v3987_v43 }
 0x194   : > { %1362 = vmatprep.mubr.f32.mxu0 %v3988_v33  ;;  %2466 = vmatprep.mubr.msk.f32.mxu1 %vm3131_vm0, %v3988_v33 }
 0x196   : > { %2805 = vmatpush1.bf16.msra.mxu0 %v3496_v50  ;;  %2835 = vmatpush3.bf16.msra.mxu1 %v3513_v4 }
 0x197   : > { %2807 = vmatprep.subr.bf16.mxu0 %v3499_v51  ;;  %2836 = vmatprep.subr.bf16.mxu1 %v3987_v43 }
 0x19a   : > { %2809 = vmatpush1.bf16.msra.mxu0 %v3502_v56  ;;  %2838 = vmatpush3.bf16.msra.mxu1 %v3523_v14 }
 0x19b   : > { %2811 = vmatprep.subr.bf16.mxu0 %v3505_v58  ;;  %2839 = vmatprep.subr.bf16.mxu1 %v3987_v43 }
 0x19e   : > { %2813 = vmatpush1.bf16.msra.mxu0 %v3510_v3  ;;  %2841 = vmatpush3.bf16.msra.mxu1 %v3533_v23 }
 0x19f   : > { %2815 = vmatprep.subr.bf16.mxu0 %v3516_v5  ;;  %2842 = vmatprep.subr.bf16.mxu1 %v3987_v43 }
 0x1a2   : > { %2817 = vmatpush1.bf16.msra.mxu0 %v3520_v12  ;;  %2844 = vmatpush3.bf16.msra.mxu1 %v3543_v32 }
 0x1a3   : > { %2819 = vmatprep.subr.bf16.mxu0 %v3526_v15  ;;  %2845 = vmatprep.subr.bf16.mxu1 %v3987_v43 }
 0x1a6   : > { %2821 = vmatpush1.bf16.msra.mxu0 %v3530_v21  ;;  %2847 = vmatpush3.bf16.msra.mxu1 %v3553_v46 }
 0x1a7   : > { %2823 = vmatprep.subr.bf16.mxu0 %v3536_v24  ;;  %2848 = vmatprep.subr.bf16.mxu1 %v3987_v43 }
 0x1aa   : > { %2825 = vmatpush1.bf16.msra.mxu0 %v3540_v30  ;;  %2850 = vmatpush3.bf16.msra.mxu1 %v3989_v2  ;;  %v2124_v30 = vld [vmem:[%s3178_s6 + $0x28] sm:$0xff] }
 0x1ab   : > { %2827 = vmatprep.subr.bf16.mxu0 %v3990_v42  ;;  %2851 = vmatprep.subr.bf16.mxu1 %v3987_v43 }
 0x1ae   : > { %2829 = vmatpush1.bf16.msra.mxu0 %v3991_v26  ;;  %2853 = vmatpush3.bf16.msra.mxu1 %v3992_v20  ;;  %v3994_v20 = vld [vmem:[#allocation19_spill] sm:$0xff] }
 0x1af   : > { %2855 = vmatprep.subr.bf16.mxu0 %v3993_v47  ;;  %2886 = vmatprep.subr.bf16.mxu1 %v3987_v43 }
 0x244   : > { %v1028_v60 = vpop.f32.mrb[4].mxu0  ;;  %v1099_v9 = vpop.f32.mrb[4].mxu1 }
 0x245   : > { %v1103_v31 = vadd.f32 %v2122_v55, %v1028_v60  ;;  %v1030_v28 = vpop.f32.mrb[5].mxu0  ;;  %v2398_v41 = vpop.f32.mrb[5].mxu1  ;;  %v1117_v42 = vadd.f32 %v1099_v9, %v3994_v20  ;;  %v2128_v55 = vld [vmem:[%s3183_s10 + $0x30] sm:$0xff] }
 0x246   : > { %v1110_v1 = vadd.f32 %v2123_v63, %v1030_v28 }
 0x247   : > { %v2125_v49 = vmul.f32 -1.442695, %v1103_v31 }
 0x248   : > { %v2126_v8 = vmul.f32 -1.442695, %v1110_v1 }
 0x249   : > { %3056 = vpow2.f32 %v2125_v49 }
 0x24a   : > { %3058 = vpow2.f32 %v2126_v8 }
 0x253   : > { %v3057_v13 = vpop.eup %3056 }
 0x254   : > { %v1107_v26 = vadd.f32 1.0, %v3057_v13  ;;  %v3059_v47 = vpop.eup %3058 }
 0x255   : > { %v1114_v46 = vadd.f32 1.0, %v3059_v47 }
 0x256   : > { %3060 = vrcp.f32 %v1107_v26  ;;  %v2129_v26 = vld [vmem:[%s3183_s10 + $0x38] sm:$0xff] }
 0x260   : > { %v3061_v2 = vpop.eup %3060 }
 0x261   : > { %v1118_v24 = vmul.f32 %v3061_v2, %v1117_v42 }
 0x263   : > { %v1119_v60 = vadd.f32 %v2124_v30, %v1118_v24 }
 0x264   : > { %v1196_v41 = vpop.f32.mrb[6].mxu0  ;;  %v1267_v31 = vpop.f32.mrb[6].mxu1 }
 0x265   : > { %3062 = vtanh.f32 %v1119_v60  ;;  %v1271_v49 = vadd.f32 %v2128_v55, %v1196_v41  ;;  %v1198_v28 = vpop.f32.mrb[7].mxu0  ;;  %v2433_v63 = vpop.f32.mrb[7].mxu1  ;;  %v2130_v55 = vld [vmem:[%s3183_s10 + $0x40] sm:$0xff] }
 0x266   : > { %3064 = vrcp.f32 %v1114_v46  ;;  %v1278_v8 = vadd.f32 %v2129_v26, %v1198_v28 }
 0x267   : > { %v2131_v1 = vmul.f32 -1.442695, %v1271_v49 }
 0x268   : > { %v2132_v2 = vmul.f32 -1.442695, %v1278_v8 }
 0x269   : > { %3066 = vpow2.f32 %v2131_v1 }
 0x26a   : > { %3068 = vpow2.f32 %v2132_v2  ;;  %v4003_v2 = vld [vmem:[#allocation19_spill] sm:$0xff] }
 0x26f   : > { %v3063_v9 = vpop.eup %3062 }
 0x270   : > { %v1121_v13 = vsub.f32 %v3704_v27, %v3063_v9  ;;  %v3065_v20 = vpop.eup %3064  ;;  %v1285_v27 = vadd.f32 %v1267_v31, %v3717_v40 }
 0x272   : > { %v1122_v42 = vmul.f32 %v3065_v20, %v1121_v13 }
 0x273   : > { %v3067_v24 = vpop.eup %3066 }
 0x274   : > { %v1275_v30 = vadd.f32 1.0, %v3067_v24  ;;  %v3798_v47 = vadd.f32 %v3063_v9, %v1122_v42  ;;  %v3069_v46 = vpop.eup %3068 }
 0x275   : > { %v1282_v49 = vadd.f32 1.0, %v3069_v46 }
 0x276   : > { %3070 = vrcp.f32 %v1275_v30  ;;  %2127 = vst [vmem:[%s3173_s28 + $0x8] sm:$0xff] %v3798_v47  ;;  %1363 = vmatmul.mubr.f32.vlgmr.msra.gmra.mrb[8].mxu0 %v3798_v47  ;;  %2467 = vmatmul.mubr.f32.vlgmr.msra.gmra.mrb[8].mxu1 %v3798_v47  ;;  %v2136_v30 = vld [vmem:[%s3178_s6 + $0x40] sm:$0xff] }
 0x277   : > { %2857 = vmatpush1.bf16.msra.mxu0 %v3562_v57  ;;  %2888 = vmatpush3.bf16.msra.mxu1 %v3587_v22 }
 0x278   : > { %2859 = vmatprep.subr.bf16.mxu0 %v3568_v61  ;;  %2889 = vmatprep.subr.bf16.mxu1 %v3987_v43 }
 0x279   : > { %1530 = vmatprep.mubr.f32.mxu0 %v3988_v33  ;;  %2501 = vmatprep.mubr.msk.f32.mxu1 %vm3131_vm0, %v3988_v33 }
 0x27b   : > { %2861 = vmatpush1.bf16.msra.mxu0 %v3573_v7  ;;  %2891 = vmatpush3.bf16.msra.mxu1 %v3598_v36 }
 0x27c   : > { %2863 = vmatprep.subr.bf16.mxu0 %v3579_v10  ;;  %2892 = vmatprep.subr.bf16.mxu1 %v3987_v43 }
 0x27f   : > { %2865 = vmatpush1.bf16.msra.mxu0 %v3584_v19  ;;  %2894 = vmatpush3.bf16.msra.mxu1 %v3610_v59 }
 0x280   : > { %v3071_v20 = vpop.eup %3070  ;;  %2867 = vmatprep.subr.bf16.mxu0 %v3590_v25  ;;  %2895 = vmatprep.subr.bf16.mxu1 %v3987_v43 }
 0x281   : > { %v1286_v60 = vmul.f32 %v3071_v20, %v1285_v27  ;;  %v2140_v27 = vld [vmem:[%s3183_s10 + $0x18] sm:$0xff] }
 0x283   : > { %v1287_v41 = vadd.f32 %v2130_v55, %v1286_v60  ;;  %2869 = vmatpush1.bf16.msra.mxu0 %v3595_v34  ;;  %2897 = vmatpush3.bf16.msra.mxu1 %v3620_v16 }
 0x284   : > { %2871 = vmatprep.subr.bf16.mxu0 %v3601_v37  ;;  %2898 = vmatprep.subr.bf16.mxu1 %v3987_v43 }
 0x285   : > { %3072 = vtanh.f32 %v1287_v41 }
 0x286   : > { %3074 = vrcp.f32 %v1282_v49 }
 0x287   : > { %2873 = vmatpush1.bf16.msra.mxu0 %v3607_v53  ;;  %2900 = vmatpush3.bf16.msra.mxu1 %v3630_v35 }
 0x288   : > { %2875 = vmatprep.subr.bf16.mxu0 %v3613_v62  ;;  %2901 = vmatprep.subr.bf16.mxu1 %v3987_v43 }
 0x28b   : > { %2877 = vmatpush1.bf16.msra.mxu0 %v3617_v11  ;;  %2903 = vmatpush3.bf16.msra.mxu1 %v3640_v54 }
 0x28c   : > { %2879 = vmatprep.subr.bf16.mxu0 %v3623_v17  ;;  %2904 = vmatprep.subr.bf16.mxu1 %v3987_v43 }
 0x28f   : > { %v3073_v31 = vpop.eup %3072  ;;  %2881 = vmatpush1.bf16.msra.mxu0 %v3627_v29  ;;  %2906 = vmatpush3.bf16.msra.mxu1 %v3648_v6 }
 0x290   : > { %2883 = vmatprep.subr.bf16.mxu0 %v3633_v39  ;;  %2907 = vmatprep.subr.bf16.mxu1 %v3987_v43  ;;  %v1289_v28 = vsub.f32 %v3748_v48, %v3073_v31  ;;  %v3075_v63 = vpop.eup %3074 }
 0x292   : > { %v1290_v1 = vmul.f32 %v3075_v63, %v1289_v28 }
 0x293   : > { %2885 = vmatpush1.bf16.msra.mxu0 %v3637_v52  ;;  %2909 = vmatpush3.bf16.msra.mxu1 %v3654_v18 }
 0x294   : > { %v3840_v26 = vadd.f32 %v3073_v31, %v1290_v1  ;;  %2911 = vmatprep.subr.bf16.mxu0 %v3484_v38  ;;  %2942 = vmatprep.subr.bf16.mxu1 %v3987_v43  ;;  %v3995_v38 = vld [vmem:[#allocation15_spill] sm:$0xff] }
 0x295   : > { %v2141_v1 = vld [vmem:[%s3183_s10 + $0x20] sm:$0xff] }
 0x296   : > { %2133 = vst [vmem:[%s3188_s13 + $0x10] sm:$0xff] %v3840_v26  ;;  %1531 = vmatmul.mubr.f32.vlgmr.msra.gmra.mrb[10].mxu0 %v3840_v26  ;;  %2502 = vmatmul.mubr.f32.vlgmr.msra.gmra.mrb[10].mxu1 %v3840_v26 }
 0x297   : > { %2913 = vmatpush1.bf16.msra.mxu0 %v3488_v44  ;;  %2944 = vmatpush3.bf16.msra.mxu1 %v3507_v0  ;;  %v3996_v44 = vld [vmem:[#allocation11_spill] sm:$0xff]  ;;  %v4002_v0 = vld [vmem:[#allocation16_spill] sm:$0xff] }
 0x298   : > { %2915 = vmatprep.subr.bf16.mxu0 %v3490_v45  ;;  %2945 = vmatprep.subr.bf16.mxu1 %v3987_v43  ;;  %v3997_v45 = vld [vmem:[#allocation12_spill] sm:$0xff] }
 0x299   : > { %1698 = vmatprep.mubr.f32.mxu0 %v3988_v33  ;;  %2536 = vmatprep.mubr.msk.f32.mxu1 %vm3131_vm0, %v3988_v33 }
 0x29b   : > { %2917 = vmatpush1.bf16.msra.mxu0 %v3496_v50  ;;  %2947 = vmatpush3.bf16.msra.mxu1 %v3513_v4  ;;  %v3998_v50 = vld [vmem:[#allocation17_spill] sm:$0xff] }
 0x29c   : > { %2919 = vmatprep.subr.bf16.mxu0 %v3499_v51  ;;  %2948 = vmatprep.subr.bf16.mxu1 %v3987_v43  ;;  %v3999_v51 = vld [vmem:[#allocation13_spill] sm:$0xff] }
 0x29f   : > { %2921 = vmatpush1.bf16.msra.mxu0 %v3502_v56  ;;  %2950 = vmatpush3.bf16.msra.mxu1 %v3523_v14  ;;  %v4000_v56 = vld [vmem:[#allocation14_spill] sm:$0xff] }
 0x2a0   : > { %2923 = vmatprep.subr.bf16.mxu0 %v3505_v58  ;;  %2951 = vmatprep.subr.bf16.mxu1 %v3987_v43  ;;  %v4001_v58 = vld [vmem:[#allocation18_spill] sm:$0xff] }
 0x2a3   : > { %2925 = vmatpush1.bf16.msra.mxu0 %v3510_v3  ;;  %2953 = vmatpush3.bf16.msra.mxu1 %v3533_v23  ;;  %v2134_v3 = vld [vmem:[%s3178_s6 + $0x30] sm:$0xff]  ;;  %v2135_v23 = vld [vmem:[%s3178_s6 + $0x38] sm:$0xff] }
 0x2a4   : > { %2927 = vmatprep.subr.bf16.mxu0 %v3516_v5  ;;  %2954 = vmatprep.subr.bf16.mxu1 %v3987_v43 }
 0x2a7   : > { %2929 = vmatpush1.bf16.msra.mxu0 %v3520_v12  ;;  %2956 = vmatpush3.bf16.msra.mxu1 %v3543_v32 }
 0x2a8   : > { %2931 = vmatprep.subr.bf16.mxu0 %v3526_v15  ;;  %2957 = vmatprep.subr.bf16.mxu1 %v3987_v43 }
 0x2ab   : > { %2933 = vmatpush1.bf16.msra.mxu0 %v3530_v21  ;;  %2959 = vmatpush3.bf16.msra.mxu1 %v3995_v38 }
 0x2ac   : > { %2935 = vmatprep.subr.bf16.mxu0 %v3996_v44  ;;  %2960 = vmatprep.subr.bf16.mxu1 %v3987_v43 }
 0x2af   : > { %2937 = vmatpush1.bf16.msra.mxu0 %v3997_v45  ;;  %2962 = vmatpush3.bf16.msra.mxu1 %v3998_v50 }
 0x2b0   : > { %2939 = vmatprep.subr.bf16.mxu0 %v3999_v51  ;;  %2963 = vmatprep.subr.bf16.mxu1 %v3987_v43 }
 0x2b3   : > { %2941 = vmatpush1.bf16.msra.mxu0 %v4000_v56  ;;  %2965 = vmatpush3.bf16.msra.mxu1 %v4001_v58 }
 0x2b4   : > { %2967 = vmatprep.subr.bf16.mxu0 %v4002_v0  ;;  %2998 = vmatprep.subr.bf16.mxu1 %v3987_v43 }
 0x349   : > { %v1364_v4 = vpop.f32.mrb[8].mxu0  ;;  %v1435_v5 = vpop.f32.mrb[8].mxu1 }
 0x34a   : > { %v1439_v12 = vadd.f32 %v2134_v3, %v1364_v4  ;;  %v1366_v14 = vpop.f32.mrb[9].mxu0  ;;  %v2468_v15 = vpop.f32.mrb[9].mxu1  ;;  %v1453_v42 = vadd.f32 %v1435_v5, %v4003_v2  ;;  %v2148_v4 = vld [vmem:[%s3178_s6 + $0x58] sm:$0xff] }
 0x34b   : > { %v1446_v32 = vadd.f32 %v2135_v23, %v1366_v14 }
 0x34c   : > { %v2137_v21 = vmul.f32 -1.442695, %v1439_v12  ;;  %v1798_v12 = vld [vmem:[%s3183_s10] sm:$0xff] }
 0x34d   : > { %v2138_v48 = vmul.f32 -1.442695, %v1446_v32 }
 0x34e   : > { %3076 = vpow2.f32 %v2137_v21 }
 0x34f   : > { %3078 = vpow2.f32 %v2138_v48 }
 0x358   : > { %v3077_v8 = vpop.eup %3076 }
 0x359   : > { %v1443_v9 = vadd.f32 1.0, %v3077_v8  ;;  %v3079_v13 = vpop.eup %3078 }
 0x35a   : > { %v1450_v55 = vadd.f32 1.0, %v3079_v13  ;;  %v1799_v13 = vld [vmem:[%s3183_s10 + $0x8] sm:$0xff] }
 0x35b   : > { %3080 = vrcp.f32 %v1443_v9 }
 0x365   : > { %v3081_v24 = vpop.eup %3080 }
 0x366   : > { %v1454_v46 = vmul.f32 %v3081_v24, %v1453_v42 }
 0x368   : > { %v1455_v20 = vadd.f32 %v2136_v30, %v1454_v46 }
 0x369   : > { %v1532_v60 = vpop.f32.mrb[10].mxu0  ;;  %v1603_v41 = vpop.f32.mrb[10].mxu1 }
 0x36a   : > { %3082 = vtanh.f32 %v1455_v20  ;;  %v1607_v49 = vadd.f32 %v2140_v27, %v1532_v60  ;;  %v1534_v31 = vpop.f32.mrb[11].mxu0  ;;  %v2503_v28 = vpop.f32.mrb[11].mxu1 }
 0x36b   : > { %3084 = vrcp.f32 %v1450_v55  ;;  %v1614_v38 = vadd.f32 %v2141_v1, %v1534_v31  ;;  %v1800_v28 = vld [vmem:[%s3183_s10 + $0x10] sm:$0xff] }
 0x36c   : > { %v2143_v63 = vmul.f32 -1.442695, %v1607_v49 }
 0x36d   : > { %v2144_v51 = vmul.f32 -1.442695, %v1614_v38 }
 0x36e   : > { %3086 = vpow2.f32 %v2143_v63 }
 0x36f   : > { %3088 = vpow2.f32 %v2144_v51 }
 0x374   : > { %v3083_v44 = vpop.eup %3082 }
 0x375   : > { %v1457_v45 = vsub.f32 %v3798_v47, %v3083_v44  ;;  %v3085_v50 = vpop.eup %3084  ;;  %v2142_v47 = vld [vmem:[%s3183_s10 + $0x28] sm:$0xff] }
 0x377   : > { %v1458_v56 = vmul.f32 %v3085_v50, %v1457_v45 }
 0x378   : > { %v3087_v58 = vpop.eup %3086 }
 0x379   : > { %v1611_v0 = vadd.f32 1.0, %v3087_v58  ;;  %v3890_v3 = vadd.f32 %v3083_v44, %v1458_v56 }
 0x37b   : > { %3090 = vrcp.f32 %v1611_v0  ;;  %2139 = vst [vmem:[%s3173_s28 + $0x10] sm:$0xff] %v3890_v3  ;;  %1699 = vmatmul.mubr.f32.vlgmr.msra.gmra.mrb[12].mxu0 %v3890_v3  ;;  %2537 = vmatmul.mubr.f32.vlgmr.msra.gmra.mrb[12].mxu1 %v3890_v3 }
 0x37c   : > { %2969 = vmatpush1.bf16.msra.mxu0 %v3562_v57  ;;  %3000 = vmatpush3.bf16.msra.mxu1 %v3587_v22  ;;  %v3089_v57 = vpop.eup %3088  ;;  %v1621_v22 = vadd.f32 %v1603_v41, %v3717_v40 }
 0x37d   : > { %2971 = vmatprep.subr.bf16.mxu0 %v3568_v61  ;;  %3001 = vmatprep.subr.bf16.mxu1 %v3987_v43 }
 0x37e   : > { %1865 = vmatprep.mubr.f32.mxu0 %v3988_v33  ;;  %2571 = vmatprep.mubr.msk.f32.mxu1 %vm3131_vm0, %v3988_v33 }
 0x380   : > { %2973 = vmatpush1.bf16.msra.mxu0 %v3573_v7  ;;  %3003 = vmatpush3.bf16.msra.mxu1 %v3598_v36  ;;  %v1618_v36 = vadd.f32 1.0, %v3089_v57 }
 0x381   : > { %2975 = vmatprep.subr.bf16.mxu0 %v3579_v10  ;;  %3004 = vmatprep.subr.bf16.mxu1 %v3987_v43 }
 0x384   : > { %2977 = vmatpush1.bf16.msra.mxu0 %v3584_v19  ;;  %3006 = vmatpush3.bf16.msra.mxu1 %v3610_v59 }
 0x385   : > { %v3091_v61 = vpop.eup %3090  ;;  %2979 = vmatprep.subr.bf16.mxu0 %v3590_v25  ;;  %3007 = vmatprep.subr.bf16.mxu1 %v3987_v43 }
 0x386   : > { %v1622_v7 = vmul.f32 %v3091_v61, %v1621_v22 }
 0x388   : > { %v1623_v33 = vadd.f32 %v2142_v47, %v1622_v7  ;;  %2981 = vmatpush1.bf16.msra.mxu0 %v3595_v34  ;;  %3009 = vmatpush3.bf16.msra.mxu1 %v3620_v16 }
 0x389   : > { %2983 = vmatprep.subr.bf16.mxu0 %v3601_v37  ;;  %3010 = vmatprep.subr.bf16.mxu1 %v3987_v43 }
 0x38a   : > { %3092 = vtanh.f32 %v1623_v33 }
 0x38b   : > { %3094 = vrcp.f32 %v1618_v36 }
 0x38c   : > { %2985 = vmatpush1.bf16.msra.mxu0 %v3607_v53  ;;  %3012 = vmatpush3.bf16.msra.mxu1 %v3630_v35  ;;  %v2146_v53 = vld [vmem:[%s3178_s6 + $0x48] sm:$0xff]  ;;  %v2147_v35 = vld [vmem:[%s3178_s6 + $0x50] sm:$0xff] }
 0x38d   : > { %2987 = vmatprep.subr.bf16.mxu0 %v3613_v62  ;;  %3013 = vmatprep.subr.bf16.mxu1 %v3987_v43 }
 0x390   : > { %2989 = vmatpush1.bf16.msra.mxu0 %v3617_v11  ;;  %3015 = vmatpush3.bf16.msra.mxu1 %v3640_v54 }
 0x391   : > { %2991 = vmatprep.subr.bf16.mxu0 %v3623_v17  ;;  %3016 = vmatprep.subr.bf16.mxu1 %v3987_v43 }
 0x394   : > { %v3093_v10 = vpop.eup %3092  ;;  %2993 = vmatpush1.bf16.msra.mxu0 %v3627_v29  ;;  %3018 = vmatpush3.bf16.msra.mxu1 %v3648_v6 }
 0x395   : > { %2995 = vmatprep.subr.bf16.mxu0 %v3633_v39  ;;  %3019 = vmatprep.subr.bf16.mxu1 %v3987_v43  ;;  %v1625_v19 = vsub.f32 %v3840_v26, %v3093_v10  ;;  %v3095_v25 = vpop.eup %3094 }
 0x397   : > { %v1626_v34 = vmul.f32 %v3095_v25, %v1625_v19 }
 0x398   : > { %2997 = vmatpush1.bf16.msra.mxu0 %v3637_v52  ;;  %3021 = vmatpush3.bf16.msra.mxu1 %v3654_v18 }
 0x399   : > { %v3932_v37 = vadd.f32 %v3093_v10, %v1626_v34 }
 0x39b   : > { %2145 = vst [vmem:[%s3188_s13 + $0x8] sm:$0xff] %v3932_v37  ;;  %1866 = vmatmul.mubr.f32.vlgmr.msra.gmra.mrb[14].mxu0 %v3932_v37  ;;  %2572 = vmatmul.mubr.f32.vlgmr.msra.gmra.mrb[14].mxu1 %v3932_v37 }
 0x44e   : > { %v1700_v59 = vpop.f32.mrb[12].mxu0  ;;  %v1771_v62 = vpop.f32.mrb[12].mxu1 }
 0x44f   : > { %v1775_v11 = vadd.f32 %v2146_v53, %v1700_v59  ;;  %v1702_v16 = vpop.f32.mrb[13].mxu0  ;;  %v2538_v17 = vpop.f32.mrb[13].mxu1  ;;  %v1789_v43 = vadd.f32 %v1771_v62, %v4003_v2 }
 0x450   : > { %v1782_v39 = vadd.f32 %v2147_v35, %v1702_v16 }
 0x451   : > { %v2149_v29 = vmul.f32 -1.442695, %v1775_v11 }
 0x452   : > { %v2150_v52 = vmul.f32 -1.442695, %v1782_v39 }
 0x453   : > { %3096 = vpow2.f32 %v2149_v29 }
 0x454   : > { %3098 = vpow2.f32 %v2150_v52 }
 0x45d   : > { %v3097_v54 = vpop.eup %3096 }
 0x45e   : > { %v1779_v6 = vadd.f32 1.0, %v3097_v54  ;;  %v3099_v18 = vpop.eup %3098 }
 0x45f   : > { %v1786_v15 = vadd.f32 1.0, %v3099_v18 }
 0x460   : > { %3100 = vrcp.f32 %v1779_v6 }
 0x46a   : > { %v3101_v26 = vpop.eup %3100 }
 0x46b   : > { %v1790_v5 = vmul.f32 %v3101_v26, %v1789_v43 }
 0x46d   : > { %v1791_v14 = vadd.f32 %v2148_v4, %v1790_v5 }
 0x46e   : > { %v1867_v21 = vpop.f32.mrb[14].mxu0  ;;  %v1938_v23 = vpop.f32.mrb[14].mxu1 }
 0x46f   : > { %3102 = vtanh.f32 %v1791_v14  ;;  %v1942_v32 = vadd.f32 %v1867_v21, %v1798_v12  ;;  %v1869_v48 = vpop.f32.mrb[15].mxu0  ;;  %v2573_v8 = vpop.f32.mrb[15].mxu1  ;;  %v1956_v49 = vadd.f32 %v1938_v23, %v3717_v40 }
 0x470   : > { %3104 = vrcp.f32 %v1786_v15  ;;  %v1949_v42 = vadd.f32 %v1869_v48, %v1799_v13 }
 0x471   : > { %v2152_v9 = vmul.f32 -1.442695, %v1942_v32 }
 0x472   : > { %v2153_v46 = vmul.f32 -1.442695, %v1949_v42 }
 0x473   : > { %3106 = vpow2.f32 %v2152_v9 }
 0x474   : > { %3108 = vpow2.f32 %v2153_v46 }
 0x479   : > { %v3103_v2 = vpop.eup %3102 }
 0x47a   : > { %v1793_v24 = vsub.f32 %v3890_v3, %v3103_v2  ;;  %v3105_v30 = vpop.eup %3104 }
 0x47c   : > { %v1794_v27 = vmul.f32 %v3105_v30, %v1793_v24 }
 0x47d   : > { %v3107_v20 = vpop.eup %3106 }
 0x47e   : > { %v1795_v55 = vadd.f32 %v3103_v2, %v1794_v27  ;;  %v1946_v60 = vadd.f32 1.0, %v3107_v20  ;;  %v3109_v41 = vpop.eup %3108 }
 0x47f   : > { %v1953_v38 = vadd.f32 1.0, %v3109_v41 }
 0x480   : > { %2151 = vst [vmem:[%s3173_s28 + $0x18] sm:$0xff] %v1795_v55  ;;  %1964 = vst [vmem:[#allocation4] sm:$0xff] %v1795_v55  ;;  %3110 = vrcp.f32 %v1946_v60 }
 0x48a   : > { %v3111_v31 = vpop.eup %3110 }
 0x48b   : > { %v1957_v63 = vmul.f32 %v3111_v31, %v1956_v49 }
 0x48d   : > { %v1958_v1 = vadd.f32 %v1957_v63, %v1800_v28 }
 0x48f   : > { %3112 = vtanh.f32 %v1958_v1 }
 0x490   : > { %3114 = vrcp.f32 %v1953_v38 }
 0x499   : > { %v3113_v44 = vpop.eup %3112 }
 0x49a   : > { %v1960_v45 = vsub.f32 %v3932_v37, %v3113_v44  ;;  %v3115_v50 = vpop.eup %3114 }
 0x49c   : > { %v1961_v51 = vmul.f32 %v3115_v50, %v1960_v45 }
 0x49e   : > { %v1962_v56 = vadd.f32 %v3113_v44, %v1961_v51 }
 0x4a0   : > { %1963 = vst [vmem:[%s3188_s13] sm:$0xff] %v1962_v56  ;;  %1965 = vst [vmem:[#allocation5] sm:$0xff] %v1962_v56 }
 0x4a1 PF: > { %s16_s18 = sadd.s32 1, %s3126_s18  }
 0x4a2   : > { %p13_p6 = scmp.ge.s32.totalorder %s16_s18, 4  }
 0x4a4   :  { %15 = sbr.rel (!%p13_p6) target bundleno = 1 (0x1), region = 177 }
 0x4ab   :  { %2008 = vsyncmov [#allocation6] }
 0x4ae   :  { %s2009_s28 = vpop.sfrf %2008 }
 0x4af   :  { %p2156_p7 = scmp.ne.s32.totalorder %s2009_s28, 0 }
 0x4b1   :  { %2013 = shalt.err (%p2156_p7)  }
 0x4b2   :  { %2015 = vsyncmov [#allocation6 + $0x1] }
 0x4b5   :  { %s2016_s6 = vpop.sfrf %2015 }
 0x4b6   :  { %p2157_p8 = scmp.ne.s32.totalorder %s2016_s6, 0 }
 0x4b8   :  { %2020 = shalt.err (%p2157_p8)  }

</bundles_post_ra>
